<compile_context>
chip_gen: v7x
topology: tpu7x:2x2x1
jax: 0.10.0
libtpu: 0.0.40
codegen_flags: <defaults>
</compile_context>

<pallas_src>
import functools

import jax
import jax.numpy as jnp
from jax import lax
from jax.experimental import pallas as pl
from jax.experimental.pallas import tpu as pltpu


_LPAD = 8  # interior column offset inside the pad scratch (sublane aligned)


# ----------------------------------------------------------------------------
# Fused Fire kernel: squeeze + depthwise3x3 + expand1x1 + concat + shuffle + ReLU
# ----------------------------------------------------------------------------
def _fire_kernel(x_ref, wsq_ref, wpw_ref, wdw_ref, o_ref, pad_ref, *, stride):
    # x_ref:   (1, H, W, Cin)      bf16 input image (NHWC)
    # wsq_ref: (Cin, C2)           bf16 folded squeeze weight (block-diag groups,
    #                              shuffle(4) and lane widening baked in)
    # wpw_ref: (C2, C2)            bf16 folded expand1x1 weight (shuffle(8) baked in)
    # wdw_ref: (3, 3, C2)          f32  folded depthwise weight (shuffle(8) baked in)
    # o_ref:   (1, Ho, Wo, C2)     f32  final Fire output (NHWC)
    # pad_ref: (H+2, W+2*_LPAD, C2) f32 scratch (zero halo + squeeze output interior)
    _, H, W, Cin = x_ref.shape
    _, Ho, Wo, C2 = o_ref.shape
    PW = pad_ref.shape[1]

    # ---- squeeze 1x1 (grouped conv + shuffle(4) + lane widening folded) -----
    x2d = x_ref[0].reshape(H * W, Cin)
    s = jnp.dot(x2d, wsq_ref[...], preferred_element_type=jnp.float32)
    s = jnp.maximum(s, 0.0)                      # squeeze ReLU
    s3 = s.reshape(H, W, C2)

    # ---- refresh the 1-pixel zero halo, write the interior (aligned) --------
    zrow = jnp.zeros((1, PW, C2), jnp.float32)
    pad_ref[pl.ds(0, 1), :, :] = zrow
    pad_ref[pl.ds(H + 1, 1), :, :] = zrow
    zcol = jnp.zeros((H + 2, 1, C2), jnp.float32)
    pad_ref[:, pl.ds(_LPAD - 1, 1), :] = zcol          # left halo column
    pad_ref[:, pl.ds(_LPAD + W, 1), :] = zcol          # right halo column
    pad_ref[pl.ds(1, H), pl.ds(_LPAD, W), :] = s3      # sublane-aligned store

    w3 = wdw_ref[...]

    if stride == 1:
        # Centre column (dx=1) taps straight from registers: no scratch re-read.
        zplane = jnp.zeros((1, W, C2), jnp.float32)
        acc = s3 * w3[1:2, 1:2, :]                                      # (dy,dx)=(1,1)
        acc = acc + jnp.concatenate([zplane, s3[:H - 1]], 0) * w3[0:1, 1:2, :]  # (0,1)
        acc = acc + jnp.concatenate([s3[1:], zplane], 0) * w3[2:3, 1:2, :]      # (2,1)
        # Left / right shifted columns: one hoisted read each, 3 row taps each.
        for dx in (0, 2):
            col = pad_ref[:, pl.ds(dx + _LPAD - 1, W), :]               # (H+2, W, C2)
            for dy in range(3):
                acc = acc + col[dy:dy + H] * w3[dy:dy + 1, dx:dx + 1, :]
        center = s                                                      # (H*W, C2)
    else:
        # Strided path: per-tap strided reads straight from the padded scratch.
        acc = jnp.zeros((Ho, Wo, C2), jnp.float32)
        center = None
        for dy in range(3):
            for dx in range(3):
                tap = pad_ref[pl.ds(dy, Ho, stride),
                              pl.ds(dx + _LPAD - 1, Wo, stride), :]
                acc = acc + tap * w3[dy:dy + 1, dx:dx + 1, :]
                if dy == 1 and dx == 1:
                    center = tap.reshape(Ho * Wo, C2)

    # ---- expand1x1 on the MXU: weight columns pre-permuted to their final
    #      (post concat + shuffle(8)) lanes, zeros on depthwise-sourced lanes.
    ex1 = jnp.dot(center.astype(jnp.bfloat16), wpw_ref[...],
                  preferred_element_type=jnp.float32)

    # ---- final Fire ReLU (concat + shuffle already baked into lanes) --------
    o_ref[0] = jnp.maximum(acc + ex1.reshape(Ho, Wo, C2), 0.0).astype(o_ref.dtype)


# ----------------------------------------------------------------------------
# Wrapper around pallas_call
# ----------------------------------------------------------------------------
def fire_pallas(x_nhwc, w_sq, w_pw, w_dw, stride=1):
    """Fully fused Fire forward in NHWC: one grid step per batch element."""
    N, H, W, Cin = x_nhwc.shape
    C2 = w_pw.shape[0]
    Ho = (H - 1) // stride + 1
    Wo = (W - 1) // stride + 1
    return pl.pallas_call(
        functools.partial(_fire_kernel, stride=stride),
        out_shape=jax.ShapeDtypeStruct((N, Ho, Wo, C2), jnp.float32),
        grid=(N,),
        in_specs=[pl.BlockSpec((1, H, W, Cin), lambda n: (n, 0, 0, 0)),
                  pl.BlockSpec((Cin, C2), lambda n: (0, 0)),
                  pl.BlockSpec((C2, C2), lambda n: (0, 0)),
                  pl.BlockSpec((3, 3, C2), lambda n: (0, 0, 0))],
        out_specs=pl.BlockSpec((1, Ho, Wo, C2), lambda n: (n, 0, 0, 0)),
        scratch_shapes=[pltpu.VMEM((H + 2, W + 2 * _LPAD, C2), jnp.float32)],
        compiler_params=pltpu.CompilerParams(
            dimension_semantics=("parallel",)),
    )(x_nhwc, w_sq, w_pw, w_dw)


# ----------------------------------------------------------------------------
# Parameters: natural (PyTorch-like) params + fold into kernel weights
# ----------------------------------------------------------------------------
def init_fire_params(key, nin, squeeze, expand1x1_out, expand3x3_out):
    assert expand3x3_out % squeeze == 0
    assert (expand1x1_out + expand3x3_out) % 8 == 0
    k1, k2, k3 = jax.random.split(key, 3)
    g_sq = 4 if nin > 24 else 1
    g_e1 = 4 if squeeze > 24 else 1
    mult = expand3x3_out // squeeze
    return {
        "w_squeeze": 0.1 * jax.random.normal(
            k1, (g_sq, nin // g_sq, squeeze // g_sq), jnp.float32),
        "w_expand1": 0.1 * jax.random.normal(
            k2, (g_e1, squeeze // g_e1, expand1x1_out // g_e1), jnp.float32),
        "w_expand3": 0.1 * jax.random.normal(
            k3, (3, 3, mult, squeeze), jnp.float32),
    }


def fold_fire_params(params, nin, squeeze, expand1x1_out, expand3x3_out):
    """Fold grouped convs, both channel shuffles and the concat into dense
    kernel weights (done once, host-side)."""
    S, e1, e3 = squeeze, expand1x1_out, expand3x3_out
    C2 = e1 + e3
    mult = e3 // S
    cpg = C2 // 8

    w_sq = params["w_squeeze"]
    w_e1 = params["w_expand1"]
    w_e3 = params["w_expand3"]
    g_sq = w_sq.shape[0]
    g_e1 = w_e1.shape[0]

    # Dense block-diagonal squeeze weight (nin, S); grouped-conv out channel
    # order is group-major (o = g * Cout_g + j), matching PyTorch.
    Wsq = jax.scipy.linalg.block_diag(*[w_sq[g] for g in range(g_sq)])
    # Fold the channel_shuffle(groups=4) that follows the squeeze conv.
    if g_sq > 1:
        c = jnp.arange(S)
        Wsq = Wsq[:, (c % 4) * (S // 4) + c // 4]

    # Dense block-diagonal expand1x1 weight (S, e1).
    W1 = jax.scipy.linalg.block_diag(*[w_e1[g] for g in range(g_e1)])

    # Final channel_shuffle(8) of concat([ex1, ex3]): out[..., j] = concat[..., src[j]]
    j = jnp.arange(C2)
    src = (j % 8) * cpg + j // 8
    is_e3 = src >= e1                              # lane fed by depthwise branch
    b = jnp.where(is_e3, (src - e1) // mult, 0)    # depthwise input channel
    m = jnp.where(is_e3, (src - e1) % mult, 0)     # depthwise multiplier index
    a = jnp.where(is_e3, 0, src)                   # expand1x1 output channel

    # Widened squeeze weight (nin, C2): depthwise-sourced lane j carries
    # squeeze channel b[j]; expand1x1-sourced lanes are zero.
    w_sq_folded = jnp.where(is_e3[None, :], Wsq[:, b], 0.0)

    # Folded depthwise weight (3, 3, C2): per-lane taps, zero on matmul lanes.
    w_dw = jnp.where(is_e3[None, None, :], w_e3[:, :, m, b], 0.0)

    # Folded expand1x1 weight (C2, C2): one representative input lane per
    # squeeze channel; output columns already in final shuffled lane order;
    # zero columns on depthwise-sourced lanes.
    rep = is_e3 & (m == 0)
    W1_rows = jnp.where(rep[:, None], W1[b, :], 0.0)        # (C2, e1)
    w_pw = jnp.where(is_e3[None, :], 0.0, W1_rows[:, a])    # (C2, C2)

    return {
        "w_sq": w_sq_folded.astype(jnp.bfloat16),
        "w_pw": w_pw.astype(jnp.bfloat16),
        "w_dw": w_dw.astype(jnp.float32),
    }


# ----------------------------------------------------------------------------
# Fire forward (matches the PyTorch module, bn=False path)
# ----------------------------------------------------------------------------
def fire_forward(x_nchw, folded, stride=1):
    # NCHW -> NHWC; bf16 halves input HBM read traffic and feeds the MXU.
    x_nhwc = jnp.transpose(x_nchw, (0, 2, 3, 1)).astype(jnp.bfloat16)
    out_nhwc = fire_pallas(x_nhwc, folded["w_sq"], folded["w_pw"],
                           folded["w_dw"], stride=stride)
    return jnp.transpose(out_nhwc, (0, 3, 1, 2)).astype(x_nchw.dtype)


# ----------------------------------------------------------------------------
# Pure-JAX reference (lax.conv) for correctness checking
# ----------------------------------------------------------------------------
def channel_shuffle_nhwc(x, groups):
    N, H, W, C = x.shape
    cpg = C // groups
    return x.reshape(N, H, W, groups, cpg).transpose(0, 1, 2, 4, 3).reshape(
        N, H, W, C)


def _ref_conv1x1_grouped(x, w, groups, stride):
    G = groups
    Cin_g = x.shape[-1] // G
    Cout_g = w.shape[2]
    k = jnp.transpose(w, (1, 0, 2)).reshape(Cin_g, G * Cout_g)[None, None]
    return lax.conv_general_dilated(
        x.astype(jnp.bfloat16), k.astype(jnp.bfloat16),
        window_strides=(stride, stride), padding="VALID",
        dimension_numbers=("NHWC", "HWIO", "NHWC"), feature_group_count=G,
        preferred_element_type=jnp.float32)


def _ref_depthwise3x3(x, w, stride):
    C = x.shape[-1]
    mult = w.shape[2]
    k = jnp.transpose(w, (0, 1, 3, 2)).reshape(3, 3, 1, C * mult)
    return lax.conv_general_dilated(
        x, k, window_strides=(stride, stride), padding=((1, 1), (1, 1)),
        dimension_numbers=("NHWC", "HWIO", "NHWC"), feature_group_count=C,
        preferred_element_type=jnp.float32)


def fire_reference(x_nchw, params, stride=1):
    x = jnp.transpose(x_nchw, (0, 2, 3, 1))
    g_sq = params["w_squeeze"].shape[0]
    s = jax.nn.relu(_ref_conv1x1_grouped(x, params["w_squeeze"], g_sq, 1))
    if g_sq > 1:
        s = channel_shuffle_nhwc(s, 4)
    g_e1 = params["w_expand1"].shape[0]
    ex1 = _ref_conv1x1_grouped(s, params["w_expand1"], g_e1, stride)
    ex3 = _ref_depthwise3x3(s, params["w_expand3"], stride)
    out = jax.nn.relu(channel_shuffle_nhwc(jnp.concatenate([ex1, ex3], -1), 8))
    return jnp.transpose(out, (0, 3, 1, 2))


# ----------------------------------------------------------------------------
if __name__ == "__main__":
    key = jax.random.PRNGKey(0)
    kx, kp = jax.random.split(key)

    # Fire(nin=32, squeeze=32, expand1x1_out=32, expand3x3_out=32)
    N, nin, H, W = 2, 32, 16, 16
    squeeze, e1_out, e3_out = 32, 32, 32
    C2 = e1_out + e3_out

    x = jax.random.normal(kx, (N, nin, H, W), jnp.float32)
    params = init_fire_params(kp, nin, squeeze, e1_out, e3_out)
    folded = fold_fire_params(params, nin, squeeze, e1_out, e3_out)

    fwd = jax.jit(fire_forward, static_argnames="stride")

    # stride = 1
    out1 = jax.block_until_ready(fwd(x, folded, stride=1))
    assert out1.shape == (N, C2, H, W), out1.shape
    ref1 = fire_reference(x, params, stride=1)
    err1 = float(jnp.max(jnp.abs(out1 - ref1)))
    assert err1 < 1e-2, f"stride=1 mismatch vs reference: {err1}"

    # stride = 2 (previously unexercised path)
    out2 = jax.block_until_ready(fwd(x, folded, stride=2))
    assert out2.shape == (N, C2, H // 2, W // 2), out2.shape
    ref2 = fire_reference(x, params, stride=2)
    err2 = float(jnp.max(jnp.abs(out2 - ref2)))
    assert err2 < 1e-2, f"stride=2 mismatch vs reference: {err2}"

    print("KERNEL_OK")
</pallas_src>

<mosaic_0001>
module attributes {stable_mosaic.version = 11 : i64} {
  func.func @_fire_kernel(%arg0: i32, %arg1: memref<1x16x16x32xbf16, #tpu.memory_space<vmem>>, %arg2: memref<32x64xbf16, #tpu.memory_space<vmem>>, %arg3: memref<64x64xbf16, #tpu.memory_space<vmem>>, %arg4: memref<3x3x64xf32, #tpu.memory_space<vmem>>, %arg5: memref<1x16x16x64xf32, #tpu.memory_space<vmem>>, %arg6: memref<18x32x64xf32, #tpu.memory_space<vmem>>) attributes {dimension_semantics = [#tpu.dimension_semantics<parallel>], iteration_bounds = array<i64: 2>, scalar_prefetch = 0 : i64, scratch_operands = 1 : i64, tpu.core_type = #tpu.core_type<tc>, window_params = [{transform_indices = @transform_0, window_bounds = array<i64: 1, 16, 16, 32>}, {pipeline_mode = #tpu.pipeline_mode<synchronous>, transform_indices = @transform_1, window_bounds = array<i64: 32, 64>}, {pipeline_mode = #tpu.pipeline_mode<synchronous>, transform_indices = @transform_2, window_bounds = array<i64: 64, 64>}, {pipeline_mode = #tpu.pipeline_mode<synchronous>, transform_indices = @transform_3, window_bounds = array<i64: 3, 3, 64>}, {transform_indices = @transform_4, window_bounds = array<i64: 1, 16, 16, 64>}]} {
    %c0 = arith.constant 0 : index
    %c0_0 = arith.constant 0 : index
    %c0_1 = arith.constant 0 : index
    %c0_2 = arith.constant 0 : index
    %0 = vector.load %arg1[%c0, %c0_0, %c0_1, %c0_2] : memref<1x16x16x32xbf16, #tpu.memory_space<vmem>>, vector<1x16x16x32xbf16>
    %1 = vector.shape_cast %0 : vector<1x16x16x32xbf16> to vector<16x16x32xbf16>
    %2 = vector.shape_cast %1 : vector<16x16x32xbf16> to vector<256x32xbf16>
    %c0_3 = arith.constant 0 : index
    %c0_4 = arith.constant 0 : index
    %3 = vector.load %arg2[%c0_3, %c0_4] : memref<32x64xbf16, #tpu.memory_space<vmem>>, vector<32x64xbf16>
    %cst = arith.constant dense<0.000000e+00> : vector<256x64xf32>
    %4 = tpu.matmul %2, %3, %cst {dimension_numbers = #tpu.dot_dimension_numbers<[1], [0], [0], [1], [0, 0, 1, 1], [], []>} : vector<256x32xbf16>, vector<32x64xbf16>, vector<256x64xf32> -> vector<256x64xf32>
    %cst_5 = arith.constant 0.000000e+00 : f32
    %5 = vector.broadcast %cst_5 : f32 to vector<256x64xf32>
    %6 = arith.maximumf %4, %5 : vector<256x64xf32>
    %7 = vector.shape_cast %6 : vector<256x64xf32> to vector<16x16x64xf32>
    %cst_6 = arith.constant 0.000000e+00 : f32
    %8 = vector.broadcast %cst_6 : f32 to vector<1x32x64xf32>
    %c0_7 = arith.constant 0 : index
    %c0_8 = arith.constant 0 : index
    %c0_9 = arith.constant 0 : index
    %9 = vector.load %arg6[%c0_7, %c0_8, %c0_9] : memref<18x32x64xf32, #tpu.memory_space<vmem>>, vector<1x32x64xf32>
    tpu.vector_store %arg6[%c0_7, %c0_8, %c0_9], %8 {strides = array<i32>} : memref<18x32x64xf32, #tpu.memory_space<vmem>>, vector<1x32x64xf32>,
    %c17 = arith.constant 17 : index
    %c0_10 = arith.constant 0 : index
    %c0_11 = arith.constant 0 : index
    %10 = vector.load %arg6[%c17, %c0_10, %c0_11] : memref<18x32x64xf32, #tpu.memory_space<vmem>>, vector<1x32x64xf32>
    tpu.vector_store %arg6[%c17, %c0_10, %c0_11], %8 {strides = array<i32>} : memref<18x32x64xf32, #tpu.memory_space<vmem>>, vector<1x32x64xf32>,
    %cst_12 = arith.constant 0.000000e+00 : f32
    %11 = vector.broadcast %cst_12 : f32 to vector<18x1x64xf32>
    %c0_13 = arith.constant 0 : index
    %c7 = arith.constant 7 : index
    %c0_14 = arith.constant 0 : index
    %12 = vector.load %arg6[%c0_13, %c7, %c0_14] : memref<18x32x64xf32, #tpu.memory_space<vmem>>, vector<18x1x64xf32>
    tpu.vector_store %arg6[%c0_13, %c7, %c0_14], %11 {strides = array<i32>} : memref<18x32x64xf32, #tpu.memory_space<vmem>>, vector<18x1x64xf32>,
    %c0_15 = arith.constant 0 : index
    %c24 = arith.constant 24 : index
    %c0_16 = arith.constant 0 : index
    %13 = vector.load %arg6[%c0_15, %c24, %c0_16] : memref<18x32x64xf32, #tpu.memory_space<vmem>>, vector<18x1x64xf32>
    tpu.vector_store %arg6[%c0_15, %c24, %c0_16], %11 {strides = array<i32>} : memref<18x32x64xf32, #tpu.memory_space<vmem>>, vector<18x1x64xf32>,
    %c1 = arith.constant 1 : index
    %c8 = arith.constant 8 : index
    %c0_17 = arith.constant 0 : index
    %14 = vector.load %arg6[%c1, %c8, %c0_17] : memref<18x32x64xf32, #tpu.memory_space<vmem>>, vector<16x16x64xf32>
    tpu.vector_store %arg6[%c1, %c8, %c0_17], %7 {strides = array<i32>} : memref<18x32x64xf32, #tpu.memory_space<vmem>>, vector<16x16x64xf32>,
    %c0_18 = arith.constant 0 : index
    %c0_19 = arith.constant 0 : index
    %c0_20 = arith.constant 0 : index
    %15 = vector.load %arg4[%c0_18, %c0_19, %c0_20] : memref<3x3x64xf32, #tpu.memory_space<vmem>>, vector<3x3x64xf32>
    %cst_21 = arith.constant 0.000000e+00 : f32
    %16 = vector.broadcast %cst_21 : f32 to vector<1x16x64xf32>
    %17 = vector.extract_strided_slice %15 {offsets = [1, 1, 0], sizes = [1, 1, 64], strides = [1, 1, 1]} : vector<3x3x64xf32> to vector<1x1x64xf32>
    %18 = vector.broadcast %17 : vector<1x1x64xf32> to vector<16x16x64xf32>
    %19 = arith.mulf %7, %18 : vector<16x16x64xf32>
    %20 = vector.extract_strided_slice %7 {offsets = [0, 0, 0], sizes = [15, 16, 64], strides = [1, 1, 1]} : vector<16x16x64xf32> to vector<15x16x64xf32>
    %21 = tpu.concatenate %16, %20 in 0 : vector<1x16x64xf32>, vector<15x16x64xf32> -> vector<16x16x64xf32>
    %22 = vector.extract_strided_slice %15 {offsets = [0, 1, 0], sizes = [1, 1, 64], strides = [1, 1, 1]} : vector<3x3x64xf32> to vector<1x1x64xf32>
    %23 = vector.broadcast %22 : vector<1x1x64xf32> to vector<16x16x64xf32>
    %24 = arith.mulf %21, %23 : vector<16x16x64xf32>
    %25 = arith.addf %19, %24 : vector<16x16x64xf32>
    %26 = vector.extract_strided_slice %7 {offsets = [1, 0, 0], sizes = [15, 16, 64], strides = [1, 1, 1]} : vector<16x16x64xf32> to vector<15x16x64xf32>
    %27 = tpu.concatenate %26, %16 in 0 : vector<15x16x64xf32>, vector<1x16x64xf32> -> vector<16x16x64xf32>
    %28 = vector.extract_strided_slice %15 {offsets = [2, 1, 0], sizes = [1, 1, 64], strides = [1, 1, 1]} : vector<3x3x64xf32> to vector<1x1x64xf32>
    %29 = vector.broadcast %28 : vector<1x1x64xf32> to vector<16x16x64xf32>
    %30 = arith.mulf %27, %29 : vector<16x16x64xf32>
    %31 = arith.addf %25, %30 : vector<16x16x64xf32>
    %c0_22 = arith.constant 0 : index
    %c7_23 = arith.constant 7 : index
    %c0_24 = arith.constant 0 : index
    %32 = vector.load %arg6[%c0_22, %c7_23, %c0_24] : memref<18x32x64xf32, #tpu.memory_space<vmem>>, vector<18x16x64xf32>
    %33 = vector.extract_strided_slice %32 {offsets = [0, 0, 0], sizes = [16, 16, 64], strides = [1, 1, 1]} : vector<18x16x64xf32> to vector<16x16x64xf32>
    %34 = vector.extract_strided_slice %15 {offsets = [0, 0, 0], sizes = [1, 1, 64], strides = [1, 1, 1]} : vector<3x3x64xf32> to vector<1x1x64xf32>
    %35 = vector.broadcast %34 : vector<1x1x64xf32> to vector<16x16x64xf32>
    %36 = arith.mulf %33, %35 : vector<16x16x64xf32>
    %37 = arith.addf %31, %36 : vector<16x16x64xf32>
    %38 = vector.extract_strided_slice %32 {offsets = [1, 0, 0], sizes = [16, 16, 64], strides = [1, 1, 1]} : vector<18x16x64xf32> to vector<16x16x64xf32>
    %39 = vector.extract_strided_slice %15 {offsets = [1, 0, 0], sizes = [1, 1, 64], strides = [1, 1, 1]} : vector<3x3x64xf32> to vector<1x1x64xf32>
    %40 = vector.broadcast %39 : vector<1x1x64xf32> to vector<16x16x64xf32>
    %41 = arith.mulf %38, %40 : vector<16x16x64xf32>
    %42 = arith.addf %37, %41 : vector<16x16x64xf32>
    %43 = vector.extract_strided_slice %32 {offsets = [2, 0, 0], sizes = [16, 16, 64], strides = [1, 1, 1]} : vector<18x16x64xf32> to vector<16x16x64xf32>
    %44 = vector.extract_strided_slice %15 {offsets = [2, 0, 0], sizes = [1, 1, 64], strides = [1, 1, 1]} : vector<3x3x64xf32> to vector<1x1x64xf32>
    %45 = vector.broadcast %44 : vector<1x1x64xf32> to vector<16x16x64xf32>
    %46 = arith.mulf %43, %45 : vector<16x16x64xf32>
    %47 = arith.addf %42, %46 : vector<16x16x64xf32>
    %c0_25 = arith.constant 0 : index
    %c9 = arith.constant 9 : index
    %c0_26 = arith.constant 0 : index
    %48 = vector.load %arg6[%c0_25, %c9, %c0_26] : memref<18x32x64xf32, #tpu.memory_space<vmem>>, vector<18x16x64xf32>
    %49 = vector.extract_strided_slice %48 {offsets = [0, 0, 0], sizes = [16, 16, 64], strides = [1, 1, 1]} : vector<18x16x64xf32> to vector<16x16x64xf32>
    %50 = vector.extract_strided_slice %15 {offsets = [0, 2, 0], sizes = [1, 1, 64], strides = [1, 1, 1]} : vector<3x3x64xf32> to vector<1x1x64xf32>
    %51 = vector.broadcast %50 : vector<1x1x64xf32> to vector<16x16x64xf32>
    %52 = arith.mulf %49, %51 : vector<16x16x64xf32>
    %53 = arith.addf %47, %52 : vector<16x16x64xf32>
    %54 = vector.extract_strided_slice %48 {offsets = [1, 0, 0], sizes = [16, 16, 64], strides = [1, 1, 1]} : vector<18x16x64xf32> to vector<16x16x64xf32>
    %55 = vector.extract_strided_slice %15 {offsets = [1, 2, 0], sizes = [1, 1, 64], strides = [1, 1, 1]} : vector<3x3x64xf32> to vector<1x1x64xf32>
    %56 = vector.broadcast %55 : vector<1x1x64xf32> to vector<16x16x64xf32>
    %57 = arith.mulf %54, %56 : vector<16x16x64xf32>
    %58 = arith.addf %53, %57 : vector<16x16x64xf32>
    %59 = vector.extract_strided_slice %48 {offsets = [2, 0, 0], sizes = [16, 16, 64], strides = [1, 1, 1]} : vector<18x16x64xf32> to vector<16x16x64xf32>
    %60 = vector.extract_strided_slice %15 {offsets = [2, 2, 0], sizes = [1, 1, 64], strides = [1, 1, 1]} : vector<3x3x64xf32> to vector<1x1x64xf32>
    %61 = vector.broadcast %60 : vector<1x1x64xf32> to vector<16x16x64xf32>
    %62 = arith.mulf %59, %61 : vector<16x16x64xf32>
    %63 = arith.addf %58, %62 : vector<16x16x64xf32>
    %64 = arith.truncf %6 : vector<256x64xf32> to vector<256x64xbf16>
    %c0_27 = arith.constant 0 : index
    %c0_28 = arith.constant 0 : index
    %65 = vector.load %arg3[%c0_27, %c0_28] : memref<64x64xbf16, #tpu.memory_space<vmem>>, vector<64x64xbf16>
    %cst_29 = arith.constant dense<0.000000e+00> : vector<256x64xf32>
    %66 = tpu.matmul %64, %65, %cst_29 {dimension_numbers = #tpu.dot_dimension_numbers<[1], [0], [0], [1], [0, 0, 1, 1], [], []>} : vector<256x64xbf16>, vector<64x64xbf16>, vector<256x64xf32> -> vector<256x64xf32>
    %67 = vector.shape_cast %66 : vector<256x64xf32> to vector<16x16x64xf32>
    %68 = arith.addf %63, %67 : vector<16x16x64xf32>
    %cst_30 = arith.constant 0.000000e+00 : f32
    %69 = vector.broadcast %cst_30 : f32 to vector<16x16x64xf32>
    %70 = arith.maximumf %68, %69 : vector<16x16x64xf32>
    %c0_31 = arith.constant 0 : index
    %c0_32 = arith.constant 0 : index
    %c0_33 = arith.constant 0 : index
    %c0_34 = arith.constant 0 : index
    %71 = vector.load %arg5[%c0_31, %c0_32, %c0_33, %c0_34] : memref<1x16x16x64xf32, #tpu.memory_space<vmem>>, vector<1x16x16x64xf32>
    %72 = vector.shape_cast %71 : vector<1x16x16x64xf32> to vector<16x16x64xf32>
    %73 = vector.shape_cast %70 : vector<16x16x64xf32> to vector<1x16x16x64xf32>
    tpu.vector_store %arg5[%c0_31, %c0_32, %c0_33, %c0_34], %73 {strides = array<i32>} : memref<1x16x16x64xf32, #tpu.memory_space<vmem>>, vector<1x16x16x64xf32>,
    return
  }
  func.func @transform_0(%arg0: i32) -> (i32, i32, i32, i32) {
    %c0_i32 = arith.constant 0 : i32
    %c0_i32_0 = arith.constant 0 : i32
    %c0_i32_1 = arith.constant 0 : i32
    %c0_i32_2 = arith.constant 0 : i32
    return %arg0, %c0_i32, %c0_i32_0, %c0_i32_1 : i32, i32, i32, i32
  }
  func.func @transform_1(%arg0: i32) -> (i32, i32) {
    %c0_i32 = arith.constant 0 : i32
    %c0_i32_0 = arith.constant 0 : i32
    %c0_i32_1 = arith.constant 0 : i32
    return %c0_i32, %c0_i32_0 : i32, i32
  }
  func.func @transform_2(%arg0: i32) -> (i32, i32) {
    %c0_i32 = arith.constant 0 : i32
    %c0_i32_0 = arith.constant 0 : i32
    %c0_i32_1 = arith.constant 0 : i32
    return %c0_i32, %c0_i32_0 : i32, i32
  }
  func.func @transform_3(%arg0: i32) -> (i32, i32, i32) {
    %c0_i32 = arith.constant 0 : i32
    %c0_i32_0 = arith.constant 0 : i32
    %c0_i32_1 = arith.constant 0 : i32
    %c0_i32_2 = arith.constant 0 : i32
    return %c0_i32, %c0_i32_0, %c0_i32_1 : i32, i32, i32
  }
  func.func @transform_4(%arg0: i32) -> (i32, i32, i32, i32) {
    %c0_i32 = arith.constant 0 : i32
    %c0_i32_0 = arith.constant 0 : i32
    %c0_i32_1 = arith.constant 0 : i32
    %c0_i32_2 = arith.constant 0 : i32
    return %arg0, %c0_i32, %c0_i32_0, %c0_i32_1 : i32, i32, i32, i32
  }
}

</mosaic_0001>

<bundles_post_ra>
// kernel: fire_forward.1
= control target key start
LH: loop header
LB: loop body
LE: loop exit
PB: predicated region body
PF: predicated region fallthrough
CT: control target
= control target key end

     0   :  { %9 = vsyncpa [#allocation4], 0  ;;  %s3377_s0 = inlined_call_operand.vmem [shape: bf16[2,16,16,32], index: 0, kind: input, shape index: {}]   ;;  %s3378_s1 = inlined_call_operand.vmem [shape: bf16[32,64], index: 1, kind: input, shape index: {}]   ;;  %s3379_s2 = inlined_call_operand.vmem [shape: bf16[64,64], index: 2, kind: input, shape index: {}]   ;;  %s3380_s3 = inlined_call_operand.vmem [shape: f32[3,3,64], index: 3, kind: input, shape index: {}]   ;;  %s3381_s4 = inlined_call_operand.hbm [shape: f32[2,16,16,64], index: 4, kind: output, shape index: {}]  }
   0x1   :  { %11 = vsyncpa [#allocation4 + $0x1], 0  ;;  %s2068_s15 = smov 0   ;;  %s2070_s16 = smov 0  }
   0x2   :  { %s2072_s17 = smov 0   ;;  %s2074_s18 = smov 0  }
   0x3 LB: > { %s2089_s19 = sadd.s32 4294967295, %s2037_s18   ;;  %s1729_s20 = sadd.s32 4294967294, %s2037_s18   ;;  %s2037_s18 = sphi %s2074_s18, %s3439_s18   ;;  %s2033_s17 = sphi %s2072_s17, %s3438_s17   ;;  %s2029_s16 = sphi %s2070_s16, %s3437_s16   ;;  %s2025_s15 = sphi %s2068_s15, %s3436_s15  }
   0x4   : > { %s2093_s21 = sadd.s32 1, %s2037_s18   ;;  %s113_s22 = sadd.s32 1, %s2033_s17 }
   0x5   : > { %s110_s23 = ssub.s32 %s2037_s18, %s2093_s21  ;;  %p123_p0 = scmp.ne.s32.totalorder %s2033_s17, %s2029_s16 }
   0x6   : > { %p111_p1 = scmp.eq.s32.totalorder %s110_s23, 0  ;;  %p124_p2 = scmp.eq.s32.totalorder %s2089_s19, 1 }
   0x7   : > { %p129_p3 = scmp.ne.s32.totalorder %s2029_s16, %s2025_s15  ;;  %p130_p4 = scmp.eq.s32.totalorder %s1729_s20, 1 }
   0x8   : > { %s2104_s24 = scalar_select %p111_p1, %s2033_s17, %s113_s22  }
   0x9   : > { %p2106_p5 = por %p124_p2, %p123_p0  ;;  %p2110_p6 = por %p130_p4, %p129_p3 }
   0xa   : > { %p1732_p7 = scmp.ge.s32.totalorder %s2037_s18, 1  ;;  %p165_p8 = scmp.lt.s32.totalorder %s2037_s18, 3 }
   0xc   : > { %p166_p9 = pnand %p1732_p7, %p165_p8 }
   0xe   : > { %169 = sbr.rel (%p166_p9) target bundleno = 541 (0x21d), region = 36 }
  0x15   : > { %v1953_v0 = vld [vmem:[%s3378_s1] sm:$0xff]   ;;  %p191_p10 = scmp.lt.s32.totalorder %s2089_s19, 1  ;;  %v1954_v1 = vld [vmem:[%s3378_s1 + $0x8] sm:$0xff]   ;;  %vm325_vm0 = vcmask 261120   ;;  %vm567_vm1 = vcmask 523264   ;;  %v1973_v20 = vld [vmem:[%s3379_s2 + $0x10] sm:$0xff]   ;;  %v650_v23 = vlaneseq }
  0x16   : > { %1835 = vmatprep.subr.bf16.mxu0 %v1953_v0  ;;  %v1971_v2 = vld [vmem:[%s3379_s2] sm:$0xff]   ;;  %v1972_v3 = vld [vmem:[%s3379_s2 + $0x8] sm:$0xff]   ;;  %v2039_v21 = vmov 0.0   ;;  %vm577_vm2 = vcmask 516096   ;;  %v1974_v22 = vld [vmem:[%s3379_s2 + $0x18] sm:$0xff]   ;;  %s188_s7 = sand.u32 1, %s2029_s16  }
  0x17   : > { %s192_s5 = scalar_select %p191_p10, %s2089_s19, 1  ;;  %1836 = vmatpush3.bf16.msra.mxu0 %v1953_v0  ;;  %1871 = vmatprep.subr.bf16.mxu1 %v1971_v2  ;;  %568 = vst.msk [vmem:[#allocation2] sm:$0xff] %vm567_vm1, %v2039_v21  ;;  %569 = vst.msk [vmem:[#allocation2 + $0x8] sm:$0xff] %vm567_vm1, %v2039_v21  ;;  %v2217_v24 = vshrl.u32 %v650_v23, 7  ;;  %v2223_v26 = vld [vmem:[%s3380_s3] sm:$0x7] }
  0x18   : > { %1837 = vmatprep.subr.bf16.mxu0 %v1954_v1  ;;  %1872 = vmatpush3.bf16.msra.mxu1 %v1971_v2  ;;  %570 = vst.msk [vmem:[#allocation2 + $0x10] sm:$0xff] %vm567_vm1, %v2039_v21  ;;  %571 = vst.msk [vmem:[#allocation2 + $0x18] sm:$0xff] %vm567_vm1, %v2039_v21  ;;  %v2228_v27 = vld [vmem:[%s3380_s3 + $0x4] sm:$0x7]  ;;  %v2233_v28 = vld [vmem:[%s3380_s3 + $0x8] sm:$0x7] }
  0x19   : > { %s1795_s10 = sshll.u32 %s192_s5, 7  ;;  %1873 = vmatprep.subr.bf16.mxu1 %v1972_v3  ;;  %573 = vst.msk [vmem:[#allocation2 + $0x220] sm:$0xff] %vm567_vm1, %v2039_v21  ;;  %574 = vst.msk [vmem:[#allocation2 + $0x228] sm:$0xff] %vm567_vm1, %v2039_v21  ;;  %v652_v25 = vsub.s32 1, %v2217_v24  ;;  %s3008_s8 = sshll.u32 %s188_s7, 8 }
  0x1a   : > { %s2133_s13 = scalar_lea.vmem %s3377_s0, %s1795_s10  ;;  %575 = vst.msk [vmem:[#allocation2 + $0x230] sm:$0xff] %vm567_vm1, %v2039_v21  ;;  %576 = vst.msk [vmem:[#allocation2 + $0x238] sm:$0xff] %vm567_vm1, %v2039_v21  ;;  %s3041_s9 = scalar_lea.vmem [#allocation3], %s3008_s8 }
  0x1b   : > { %v1955_v4 = vld [vmem:[%s2133_s13] sm:$0xff]   ;;  %1838 = vmatpush3.bf16.msra.mxu0 %v1954_v1  ;;  %v1956_v5 = vld [vmem:[%s2133_s13 + $0x8] sm:$0xff]   ;;  %v1957_v6 = vld [vmem:[%s2133_s13 + $0x10] sm:$0xff]   ;;  %579 = vst.msk [vmem:[#allocation2 + $0x27] sm:$0x1] %vm577_vm2, %v2039_v21  ;;  %v2236_v29 = vrot.slane %v2223_v26, %v652_v25  ;;  %v2239_v30 = vrot.slane %v2228_v27, %v652_v25  ;;  %v2242_v33 = vrot.slane %v2233_v28, %v652_v25  ;;  %s1796_s10 = sshll.u32 %s2089_s19, 12 }
  0x1c   : > { %1839 = vmatprep.mubr.msk.bf16.mxu0 %vm325_vm0, %v1955_v4  ;;  %1874 = vmatpush3.bf16.msra.mxu1 %v1972_v3  ;;  %v1958_v7 = vld [vmem:[%s2133_s13 + $0x18] sm:$0xff]   ;;  %v1959_v8 = vld [vmem:[%s2133_s13 + $0x20] sm:$0xff]   ;;  %v1960_v9 = vld [vmem:[%s2133_s13 + $0x28] sm:$0xff]   ;;  %580 = vst.msk [vmem:[#allocation2 + $0x47] sm:$0x1] %vm577_vm2, %v2039_v21  ;;  %s1667_s11 = sshll.u32 %s3041_s9, 4  ;;  %s3324_s14 = scalar_lea.hbm %s3381_s4, %s1796_s10  ;;  %s3326_s11 = int_to_ptr.vmem [resolvable:$true] %s1667_s11 }
  0x1d   : > { %v1961_v10 = vld [vmem:[%s2133_s13 + $0x30] sm:$0xff]   ;;  %v1962_v11 = vld [vmem:[%s2133_s13 + $0x38] sm:$0xff]   ;;  %v1963_v12 = vld [vmem:[%s2133_s13 + $0x40] sm:$0xff]   ;;  %1875 = vmatprep.subr.bf16.mxu1 %v1973_v20  ;;  %581 = vst.msk [vmem:[#allocation2 + $0x67] sm:$0x1] %vm577_vm2, %v2039_v21  ;;  %v690_v36 = vmul.f32 0.0, %v2236_v29 }
  0x1e   : > { %1840 = vmatmul.mubr.msk.bf16.vlgmr.msra.gmra.mrb[0].mxu0 %vm325_vm0, %v1956_v5  ;;  %v1964_v13 = vld [vmem:[%s2133_s13 + $0x48] sm:$0xff]   ;;  %v1965_v14 = vld [vmem:[%s2133_s13 + $0x50] sm:$0xff]   ;;  %v1966_v15 = vld [vmem:[%s2133_s13 + $0x58] sm:$0xff]   ;;  %582 = vst.msk [vmem:[#allocation2 + $0x87] sm:$0x1] %vm577_vm2, %v2039_v21  ;;  %s3336_s19 = scalar_lea.sflag [#allocation4], %s188_s7 }
  0x1f   : > { %1843 = vmatprep.mubr.msk.bf16.mxu0 %vm325_vm0, %v1957_v6  ;;  %v1967_v16 = vld [vmem:[%s2133_s13 + $0x60] sm:$0xff]   ;;  %v1968_v17 = vld [vmem:[%s2133_s13 + $0x68] sm:$0xff]   ;;  %v1969_v18 = vld [vmem:[%s2133_s13 + $0x70] sm:$0xff]   ;;  %583 = vst.msk [vmem:[#allocation2 + $0xa7] sm:$0x1] %vm577_vm2, %v2039_v21  ;;  %s1975_s20 = scalar_lea.vmem %s3326_s11, 4096 }
  0x20   : > { %v1970_v19 = vld [vmem:[%s2133_s13 + $0x78] sm:$0xff]   ;;  %1876 = vmatpush3.bf16.msra.mxu1 %v1973_v20  ;;  %584 = vst.msk [vmem:[#allocation2 + $0xc7] sm:$0x1] %vm577_vm2, %v2039_v21  ;;  %585 = vst.msk [vmem:[#allocation2 + $0xe7] sm:$0x1] %vm577_vm2, %v2039_v21  ;;  %p1976_p11 = scmp.ne.s32.totalorder %s3326_s11, %s1975_s20  ;;  %s2040_s22 = smov [#allocation3]  }
  0x21   : > { %586 = vst.msk [vmem:[#allocation2 + $0x107] sm:$0x1] %vm577_vm2, %v2039_v21  ;;  %587 = vst.msk [vmem:[#allocation2 + $0x127] sm:$0x1] %vm577_vm2, %v2039_v21  ;;  %1877 = vmatprep.subr.bf16.mxu1 %v1974_v22  ;;  %s1979_s23 = sshll.u32 %s2040_s22, 4  ;;  %s1980_s23 = int_to_ptr.vmem [resolvable:$false] %s1979_s23 }
  0x22   : > { %588 = vst.msk [vmem:[#allocation2 + $0x147] sm:$0x1] %vm577_vm2, %v2039_v21  ;;  %589 = vst.msk [vmem:[#allocation2 + $0x167] sm:$0x1] %vm577_vm2, %v2039_v21  ;;  %p1977_p12 = pnand %p1976_p11, %p2106_p5  ;;  %s1981_s27 = scalar_lea.vmem %s1980_s23, 8192 }
  0x23   : > { %590 = vst.msk [vmem:[#allocation2 + $0x187] sm:$0x1] %vm577_vm2, %v2039_v21  ;;  %591 = vst.msk [vmem:[#allocation2 + $0x1a7] sm:$0x1] %vm577_vm2, %v2039_v21  ;;  %p1982_p0 = scmp.lt.s32.totalorder %s3326_s11, %s1980_s23  ;;  %p1983_p1 = scmp.lt.s32.totalorder %s1981_s27, %s1975_s20 }
  0x24   : > { %592 = vst.msk [vmem:[#allocation2 + $0x1c7] sm:$0x1] %vm577_vm2, %v2039_v21  ;;  %593 = vst.msk [vmem:[#allocation2 + $0x1e7] sm:$0x1] %vm577_vm2, %v2039_v21  ;;  %1878 = vmatpush3.bf16.msra.mxu1 %v1974_v22  ;;  %p1978_p13 = pneg %p1977_p12 }
  0x25   : > { %594 = vst.msk [vmem:[#allocation2 + $0x207] sm:$0x1] %vm577_vm2, %v2039_v21  ;;  %597 = vst.msk [vmem:[#allocation2 + $0x38] sm:$0x1] %vm577_vm2, %v2039_v21  ;;  %p1984_p2 = por %p1983_p1, %p1982_p0 }
  0x26   : > { %1844 = vmatmul.mubr.msk.bf16.gmra.mrb[4].mxu0 %vm325_vm0, %v1958_v7  ;;  %598 = vst.msk [vmem:[#allocation2 + $0x58] sm:$0x1] %vm577_vm2, %v2039_v21  ;;  %599 = vst.msk [vmem:[#allocation2 + $0x78] sm:$0x1] %vm577_vm2, %v2039_v21 }
  0x27   : > { %1847 = vmatprep.mubr.msk.bf16.mxu0 %vm325_vm0, %v1959_v8  ;;  %600 = vst.msk [vmem:[#allocation2 + $0x98] sm:$0x1] %vm577_vm2, %v2039_v21  ;;  %601 = vst.msk [vmem:[#allocation2 + $0xb8] sm:$0x1] %vm577_vm2, %v2039_v21  ;;  %p1985_p3 = pnand %p1984_p2, %p1978_p13 }
  0x28   : > { %602 = vst.msk [vmem:[#allocation2 + $0xd8] sm:$0x1] %vm577_vm2, %v2039_v21  ;;  %603 = vst.msk [vmem:[#allocation2 + $0xf8] sm:$0x1] %vm577_vm2, %v2039_v21 }
  0x29   : > { %604 = vst.msk [vmem:[#allocation2 + $0x118] sm:$0x1] %vm577_vm2, %v2039_v21  ;;  %605 = vst.msk [vmem:[#allocation2 + $0x138] sm:$0x1] %vm577_vm2, %v2039_v21 }
  0x2a   : > { %606 = vst.msk [vmem:[#allocation2 + $0x158] sm:$0x1] %vm577_vm2, %v2039_v21  ;;  %607 = vst.msk [vmem:[#allocation2 + $0x178] sm:$0x1] %vm577_vm2, %v2039_v21 }
  0x2b   : > { %608 = vst.msk [vmem:[#allocation2 + $0x198] sm:$0x1] %vm577_vm2, %v2039_v21  ;;  %609 = vst.msk [vmem:[#allocation2 + $0x1b8] sm:$0x1] %vm577_vm2, %v2039_v21 }
  0x2c   : > { %610 = vst.msk [vmem:[#allocation2 + $0x1d8] sm:$0x1] %vm577_vm2, %v2039_v21  ;;  %611 = vst.msk [vmem:[#allocation2 + $0x1f8] sm:$0x1] %vm577_vm2, %v2039_v21 }
  0x2d   : > { %612 = vst.msk [vmem:[#allocation2 + $0x218] sm:$0x1] %vm577_vm2, %v2039_v21  ;;  %578 = vst.msk [vmem:[#allocation2 + $0x7] sm:$0x1] %vm577_vm2, %v2039_v21 }
  0x2e   : > { %1848 = vmatmul.mubr.msk.bf16.gmra.mrb[8].mxu0 %vm325_vm0, %v1960_v9  ;;  %595 = vst.msk [vmem:[#allocation2 + $0x227] sm:$0x1] %vm577_vm2, %v2039_v21  ;;  %596 = vst.msk [vmem:[#allocation2 + $0x18] sm:$0x1] %vm577_vm2, %v2039_v21 }
  0x2f   : > { %1851 = vmatprep.mubr.msk.bf16.mxu0 %vm325_vm0, %v1961_v10  ;;  %613 = vst.msk [vmem:[#allocation2 + $0x238] sm:$0x1] %vm577_vm2, %v2039_v21  ;;  %3394 = vst [vmem:[#allocation6_spill] sm:$0xff] %v2217_v24 }
  0x30   : > { %3395 = vst [vmem:[#allocation7_spill] sm:$0xff] %v2223_v26  ;;  %3396 = vst [vmem:[#allocation8_spill] sm:$0xff] %v2228_v27 }
  0x31   : > { %3397 = vst [vmem:[#allocation9_spill] sm:$0xff] %v2233_v28  ;;  %3398 = vst [vmem:[#allocation10_spill] sm:$0xff] %v2242_v33 }
  0x36   : > { %1852 = vmatmul.mubr.msk.bf16.gmra.mrb[12].mxu0 %vm325_vm0, %v1962_v11 }
  0x37   : > { %1855 = vmatprep.mubr.msk.bf16.mxu0 %vm325_vm0, %v1963_v12 }
  0x3e   : > { %1856 = vmatmul.mubr.msk.bf16.gmra.mrb[16].mxu0 %vm325_vm0, %v1964_v13 }
  0x3f   : > { %1859 = vmatprep.mubr.msk.bf16.mxu0 %vm325_vm0, %v1965_v14 }
  0x46   : > { %1860 = vmatmul.mubr.msk.bf16.gmra.mrb[20].mxu0 %vm325_vm0, %v1966_v15 }
  0x47   : > { %1863 = vmatprep.mubr.msk.bf16.mxu0 %vm325_vm0, %v1967_v16 }
  0x4e   : > { %1864 = vmatmul.mubr.msk.bf16.gmra.mrb[24].mxu0 %vm325_vm0, %v1968_v17 }
  0x4f   : > { %1867 = vmatprep.mubr.msk.bf16.mxu0 %vm325_vm0, %v1969_v18 }
  0x56   : > { %1868 = vmatmul.mubr.msk.bf16.gmra.mrb[28].mxu0 %vm325_vm0, %v1970_v19 }
  0xf1   : > { %v1841_v31 = vpop.f32.mrb[0].mxu0 }
  0xf2   : > { %v537_v32 = vmax.f32 %v1841_v31, 0.0  ;;  %v408_v34 = vpop.f32.mrb[1].mxu0 }
  0xf3   : > { %v535_v35 = vmax.f32 %v408_v34, 0.0  ;;  %v1842_v37 = vpop.f32.mrb[2].mxu0 }
  0xf4   : > { %617 = vst.msk [vmem:[#allocation2 + $0x48] sm:$0xff] %vm567_vm1, %v537_v32  ;;  %v656_v38 = vmul.f32 %v2239_v30, %v537_v32  ;;  %v538_v39 = vmax.f32 %v1842_v37, 0.0  ;;  %v411_v40 = vpop.f32.mrb[3].mxu0  ;;  %v757_v44 = vmul.f32 %v2242_v33, %v537_v32  ;;  %v693_v62 = vmul.f32 %v2236_v29, %v537_v32 }
  0xf5   : > { %615 = vst.msk [vmem:[#allocation2 + $0x28] sm:$0xff] %vm567_vm1, %v535_v35  ;;  %v654_v41 = vmul.f32 %v2239_v30, %v535_v35  ;;  %v691_v42 = vmul.f32 %v2236_v29, %v535_v35  ;;  %v536_v43 = vmax.f32 %v411_v40, 0.0 }
  0xf6   : > { %618 = vst.msk [vmem:[#allocation2 + $0x50] sm:$0xff] %vm567_vm1, %v538_v39  ;;  %v657_v45 = vmul.f32 %v2239_v30, %v538_v39  ;;  %v1301_v46 = vpack.c.bf16 %v538_v39, %v537_v32  ;;  %v758_v53 = vmul.f32 %v2242_v33, %v538_v39  ;;  %v694_v6 = vmul.f32 %v2236_v29, %v538_v39 }
  0xf7   : > { %v721_v47 = vadd.f32 %v690_v36, %v654_v41  ;;  %v723_v48 = vadd.f32 %v691_v42, %v656_v38  ;;  %616 = vst.msk [vmem:[#allocation2 + $0x30] sm:$0xff] %vm567_vm1, %v536_v43  ;;  %v655_v49 = vmul.f32 %v2239_v30, %v536_v43  ;;  %v692_v50 = vmul.f32 %v2236_v29, %v536_v43 }
  0xf8   : > { %v1300_v51 = vpack.c.bf16 %v536_v43, %v535_v35 }
  0xf9   : > { %v2256_v52 = vadd.f32 %v757_v44, %v721_v47  ;;  %v722_v54 = vadd.f32 %v690_v36, %v655_v49  ;;  %v2259_v55 = vadd.f32 %v692_v50, %v657_v45  ;;  %v1845_v56 = vpop.f32.mrb[4].mxu0 }
  0xfa   : > { %v2261_v57 = vmax.f32 %v1845_v56, 0.0  ;;  %1879 = vmatprep.mubr.msk.bf16.mxu1 %vm567_vm1, %v1300_v51  ;;  %v424_v58 = vpop.f32.mrb[5].mxu0 }
  0xfb   : > { %3399 = vst [vmem:[#allocation11_spill] sm:$0xff] %v2256_v52  ;;  %v2264_v59 = vadd.f32 %v758_v53, %v722_v54  ;;  %v539_v60 = vmax.f32 %v424_v58, 0.0  ;;  %1880 = vmatmul.mubr.msk.bf16.vlgmr.msra.gmra.mrb[0].mxu1 %vm567_vm1, %v1301_v46  ;;  %v1846_v61 = vpop.f32.mrb[6].mxu0 }
  0xfc   : > { %621 = vst.msk [vmem:[#allocation2 + $0x88] sm:$0xff] %vm567_vm1, %v2261_v57  ;;  %v660_v63 = vmul.f32 %v2239_v30, %v2261_v57  ;;  %v2272_v0 = vmax.f32 %v1846_v61, 0.0  ;;  %v427_v1 = vpop.f32.mrb[7].mxu0  ;;  %v697_v31 = vmul.f32 %v2236_v29, %v2261_v57 }
  0xfd   : > { %3400 = vst [vmem:[#allocation12_spill] sm:$0xff] %v2264_v59  ;;  %619 = vst.msk [vmem:[#allocation2 + $0x68] sm:$0xff] %vm567_vm1, %v539_v60  ;;  %v658_v2 = vmul.f32 %v2239_v30, %v539_v60  ;;  %v695_v3 = vmul.f32 %v2236_v29, %v539_v60  ;;  %v759_v4 = vmul.f32 %v2242_v33, %v539_v60  ;;  %v540_v5 = vmax.f32 %v427_v1, 0.0 }
  0xfe   : > { %622 = vst.msk [vmem:[#allocation2 + $0x90] sm:$0xff] %vm567_vm1, %v2272_v0  ;;  %v661_v7 = vmul.f32 %v2239_v30, %v2272_v0  ;;  %v1303_v8 = vpack.c.bf16 %v2272_v0, %v2261_v57  ;;  %v698_v36 = vmul.f32 %v2236_v29, %v2272_v0 }
  0xff   : > { %v2285_v9 = vadd.f32 %v693_v62, %v658_v2  ;;  %v2287_v10 = vadd.f32 %v695_v3, %v660_v63  ;;  %620 = vst.msk [vmem:[#allocation2 + $0x70] sm:$0xff] %vm567_vm1, %v540_v5  ;;  %v659_v11 = vmul.f32 %v2239_v30, %v540_v5  ;;  %v696_v12 = vmul.f32 %v2236_v29, %v540_v5 }
 0x100   : > { %v1302_v13 = vpack.c.bf16 %v540_v5, %v539_v60  ;;  %v2292_v14 = vadd.f32 %v759_v4, %v723_v48  ;;  %v760_v37 = vmul.f32 %v2242_v33, %v540_v5 }
 0x101   : > { %v2294_v15 = vadd.f32 %v694_v6, %v659_v11  ;;  %v2296_v16 = vadd.f32 %v696_v12, %v661_v7  ;;  %v1849_v17 = vpop.f32.mrb[8].mxu0 }
 0x102   : > { %3401 = vst [vmem:[#allocation13_spill] sm:$0xff] %v2292_v14  ;;  %v2298_v18 = vmax.f32 %v1849_v17, 0.0  ;;  %1883 = vmatprep.mubr.msk.bf16.mxu1 %vm567_vm1, %v1302_v13  ;;  %v440_v19 = vpop.f32.mrb[9].mxu0  ;;  %v2349_v50 = vadd.f32 %v760_v37, %v2259_v55 }
 0x103   : > { %v2301_v20 = vmax.f32 %v440_v19, 0.0  ;;  %1884 = vmatmul.mubr.msk.bf16.gmra.mrb[4].mxu1 %vm567_vm1, %v1303_v8  ;;  %v1850_v21 = vpop.f32.mrb[10].mxu0 }
 0x104   : > { %625 = vst.msk [vmem:[#allocation2 + $0xc8] sm:$0xff] %vm567_vm1, %v2298_v18  ;;  %v664_v22 = vmul.f32 %v2239_v30, %v2298_v18  ;;  %v2308_v23 = vmax.f32 %v1850_v21, 0.0  ;;  %v443_v25 = vpop.f32.mrb[11].mxu0  ;;  %3402 = vst [vmem:[#allocation14_spill] sm:$0xff] %v2349_v50  ;;  %v701_v60 = vmul.f32 %v2236_v29, %v2298_v18 }
 0x105   : > { %623 = vst.msk [vmem:[#allocation2 + $0xa8] sm:$0xff] %vm567_vm1, %v2301_v20  ;;  %v662_v32 = vmul.f32 %v2239_v30, %v2301_v20  ;;  %v699_v34 = vmul.f32 %v2236_v29, %v2301_v20  ;;  %v2318_v35 = vmax.f32 %v443_v25, 0.0 }
 0x106   : > { %626 = vst.msk [vmem:[#allocation2 + $0xd0] sm:$0xff] %vm567_vm1, %v2308_v23  ;;  %v665_v38 = vmul.f32 %v2239_v30, %v2308_v23  ;;  %v1305_v39 = vpack.c.bf16 %v2308_v23, %v2298_v18  ;;  %v702_v63 = vmul.f32 %v2236_v29, %v2308_v23 }
 0x107   : > { %v2329_v40 = vadd.f32 %v697_v31, %v662_v32  ;;  %v2331_v41 = vadd.f32 %v699_v34, %v664_v22  ;;  %624 = vst.msk [vmem:[#allocation2 + $0xb0] sm:$0xff] %vm567_vm1, %v2318_v35  ;;  %v663_v42 = vmul.f32 %v2239_v30, %v2318_v35  ;;  %v700_v43 = vmul.f32 %v2236_v29, %v2318_v35 }
 0x108   : > { %v1304_v44 = vpack.c.bf16 %v2318_v35, %v2301_v20 }
 0x109   : > { %v2341_v45 = vadd.f32 %v698_v36, %v663_v42  ;;  %v2343_v46 = vadd.f32 %v700_v43, %v665_v38  ;;  %v1853_v47 = vpop.f32.mrb[12].mxu0  ;;  %v763_v38 = vmul.f32 %v2242_v33, %v2301_v20 }
 0x10a   : > { %v2345_v48 = vmax.f32 %v1853_v47, 0.0  ;;  %1887 = vmatprep.mubr.msk.bf16.mxu1 %vm567_vm1, %v1304_v44  ;;  %v456_v49 = vpop.f32.mrb[13].mxu0 }
 0x10b   : > { %v2351_v51 = vmax.f32 %v456_v49, 0.0  ;;  %1888 = vmatmul.mubr.msk.bf16.gmra.mrb[8].mxu1 %vm567_vm1, %v1305_v39  ;;  %v1854_v53 = vpop.f32.mrb[14].mxu0 }
 0x10c   : > { %629 = vst.msk [vmem:[#allocation2 + $0x108] sm:$0xff] %vm567_vm1, %v2345_v48  ;;  %v668_v54 = vmul.f32 %v2239_v30, %v2345_v48  ;;  %v2358_v56 = vmax.f32 %v1854_v53, 0.0  ;;  %v459_v58 = vpop.f32.mrb[15].mxu0  ;;  %v705_v32 = vmul.f32 %v2236_v29, %v2345_v48 }
 0x10d   : > { %627 = vst.msk [vmem:[#allocation2 + $0xe8] sm:$0xff] %vm567_vm1, %v2351_v51  ;;  %v666_v55 = vmul.f32 %v2239_v30, %v2351_v51  ;;  %v703_v61 = vmul.f32 %v2236_v29, %v2351_v51  ;;  %v2368_v62 = vmax.f32 %v459_v58, 0.0 }
 0x10e   : > { %630 = vst.msk [vmem:[#allocation2 + $0x110] sm:$0xff] %vm567_vm1, %v2358_v56  ;;  %v669_v1 = vmul.f32 %v2239_v30, %v2358_v56  ;;  %v1307_v2 = vpack.c.bf16 %v2358_v56, %v2345_v48  ;;  %v706_v39 = vmul.f32 %v2236_v29, %v2358_v56 }
 0x10f   : > { %v2378_v3 = vadd.f32 %v701_v60, %v666_v55  ;;  %v2380_v4 = vadd.f32 %v703_v61, %v668_v54  ;;  %628 = vst.msk [vmem:[#allocation2 + $0xf0] sm:$0xff] %vm567_vm1, %v2368_v62  ;;  %v667_v5 = vmul.f32 %v2239_v30, %v2368_v62  ;;  %v704_v6 = vmul.f32 %v2236_v29, %v2368_v62 }
 0x110   : > { %v1306_v7 = vpack.c.bf16 %v2368_v62, %v2351_v51 }
 0x111   : > { %v2390_v8 = vadd.f32 %v702_v63, %v667_v5  ;;  %v2392_v11 = vadd.f32 %v704_v6, %v669_v1  ;;  %v1857_v12 = vpop.f32.mrb[16].mxu0 }
 0x112   : > { %v2394_v13 = vmax.f32 %v1857_v12, 0.0  ;;  %1891 = vmatprep.mubr.msk.bf16.mxu1 %vm567_vm1, %v1306_v7  ;;  %v472_v17 = vpop.f32.mrb[17].mxu0 }
 0x113   : > { %v2397_v19 = vmax.f32 %v472_v17, 0.0  ;;  %1892 = vmatmul.mubr.msk.bf16.gmra.mrb[12].mxu1 %vm567_vm1, %v1307_v2  ;;  %v1858_v21 = vpop.f32.mrb[18].mxu0  ;;  %v2449_v2 = vadd.f32 %v763_v38, %v2287_v10 }
 0x114   : > { %633 = vst.msk [vmem:[#allocation2 + $0x148] sm:$0xff] %vm567_vm1, %v2394_v13  ;;  %v672_v22 = vmul.f32 %v2239_v30, %v2394_v13  ;;  %v2404_v25 = vmax.f32 %v1858_v21, 0.0  ;;  %v475_v31 = vpop.f32.mrb[19].mxu0  ;;  %v709_v12 = vmul.f32 %v2236_v29, %v2394_v13 }
 0x115   : > { %631 = vst.msk [vmem:[#allocation2 + $0x128] sm:$0xff] %vm567_vm1, %v2397_v19  ;;  %v670_v34 = vmul.f32 %v2239_v30, %v2397_v19  ;;  %v707_v36 = vmul.f32 %v2236_v29, %v2397_v19  ;;  %v2414_v37 = vmax.f32 %v475_v31, 0.0  ;;  %3403 = vst [vmem:[#allocation15_spill] sm:$0xff] %v2449_v2 }
 0x116   : > { %634 = vst.msk [vmem:[#allocation2 + $0x150] sm:$0xff] %vm567_vm1, %v2404_v25  ;;  %v673_v42 = vmul.f32 %v2239_v30, %v2404_v25  ;;  %v1309_v43 = vpack.c.bf16 %v2404_v25, %v2394_v13 }
 0x117   : > { %v2426_v44 = vadd.f32 %v705_v32, %v670_v34  ;;  %v2428_v47 = vadd.f32 %v707_v36, %v672_v22  ;;  %632 = vst.msk [vmem:[#allocation2 + $0x130] sm:$0xff] %vm567_vm1, %v2414_v37  ;;  %v671_v20 = vmul.f32 %v2239_v30, %v2414_v37  ;;  %v708_v49 = vmul.f32 %v2236_v29, %v2414_v37 }
 0x118   : > { %v1308_v53 = vpack.c.bf16 %v2414_v37, %v2397_v19  ;;  %v710_v22 = vmul.f32 %v2236_v29, %v2404_v25 }
 0x119   : > { %v2438_v54 = vadd.f32 %v706_v39, %v671_v20  ;;  %v2440_v58 = vadd.f32 %v708_v49, %v673_v42  ;;  %v1861_v60 = vpop.f32.mrb[20].mxu0 }
 0x11a   : > { %v2442_v55 = vmax.f32 %v1861_v60, 0.0  ;;  %1895 = vmatprep.mubr.msk.bf16.mxu1 %vm567_vm1, %v1308_v53  ;;  %v488_v61 = vpop.f32.mrb[21].mxu0 }
 0x11b   : > { %v2445_v63 = vmax.f32 %v488_v61, 0.0  ;;  %1896 = vmatmul.mubr.msk.bf16.gmra.mrb[16].mxu1 %vm567_vm1, %v1309_v43  ;;  %v1862_v1 = vpop.f32.mrb[22].mxu0 }
 0x11c   : > { %637 = vst.msk [vmem:[#allocation2 + $0x188] sm:$0xff] %vm567_vm1, %v2442_v55  ;;  %v676_v5 = vmul.f32 %v2239_v30, %v2442_v55  ;;  %v2455_v6 = vmax.f32 %v1862_v1, 0.0  ;;  %v491_v7 = vpop.f32.mrb[23].mxu0 }
 0x11d   : > { %635 = vst.msk [vmem:[#allocation2 + $0x168] sm:$0xff] %vm567_vm1, %v2445_v63  ;;  %v674_v17 = vmul.f32 %v2239_v30, %v2445_v63  ;;  %v711_v10 = vmul.f32 %v2236_v29, %v2445_v63  ;;  %v2465_v21 = vmax.f32 %v491_v7, 0.0 }
 0x11e   : > { %638 = vst.msk [vmem:[#allocation2 + $0x190] sm:$0xff] %vm567_vm1, %v2455_v6  ;;  %v677_v31 = vmul.f32 %v2239_v30, %v2455_v6  ;;  %v1311_v32 = vpack.c.bf16 %v2455_v6, %v2442_v55 }
 0x11f   : > { %v2475_v34 = vadd.f32 %v709_v12, %v674_v17  ;;  %v2477_v36 = vadd.f32 %v711_v10, %v676_v5  ;;  %636 = vst.msk [vmem:[#allocation2 + $0x170] sm:$0xff] %vm567_vm1, %v2465_v21  ;;  %v675_v38 = vmul.f32 %v2239_v30, %v2465_v21  ;;  %v712_v39 = vmul.f32 %v2236_v29, %v2465_v21 }
 0x120   : > { %v1310_v42 = vpack.c.bf16 %v2465_v21, %v2445_v63  ;;  %v713_v17 = vmul.f32 %v2236_v29, %v2442_v55 }
 0x121   : > { %v2487_v43 = vadd.f32 %v710_v22, %v675_v38  ;;  %v2489_v20 = vadd.f32 %v712_v39, %v677_v31  ;;  %v1865_v49 = vpop.f32.mrb[24].mxu0  ;;  %v714_v38 = vmul.f32 %v2236_v29, %v2455_v6 }
 0x122   : > { %v2491_v53 = vmax.f32 %v1865_v49, 0.0  ;;  %1899 = vmatprep.mubr.msk.bf16.mxu1 %vm567_vm1, %v1310_v42  ;;  %v504_v60 = vpop.f32.mrb[25].mxu0 }
 0x123   : > { %v2494_v61 = vmax.f32 %v504_v60, 0.0  ;;  %1900 = vmatmul.mubr.msk.bf16.gmra.mrb[20].mxu1 %vm567_vm1, %v1311_v32  ;;  %v1866_v1 = vpop.f32.mrb[26].mxu0  ;;  %v761_v32 = vmul.f32 %v2242_v33, %v2261_v57 }
 0x124   : > { %641 = vst.msk [vmem:[#allocation2 + $0x1c8] sm:$0xff] %vm567_vm1, %v2491_v53  ;;  %v680_v5 = vmul.f32 %v2239_v30, %v2491_v53  ;;  %v2501_v7 = vmax.f32 %v1866_v1, 0.0  ;;  %v507_v12 = vpop.f32.mrb[27].mxu0 }
 0x125   : > { %639 = vst.msk [vmem:[#allocation2 + $0x1a8] sm:$0xff] %vm567_vm1, %v2494_v61  ;;  %v678_v10 = vmul.f32 %v2239_v30, %v2494_v61  ;;  %v715_v22 = vmul.f32 %v2236_v29, %v2494_v61  ;;  %v2511_v31 = vmax.f32 %v507_v12, 0.0 }
 0x126   : > { %642 = vst.msk [vmem:[#allocation2 + $0x1d0] sm:$0xff] %vm567_vm1, %v2501_v7  ;;  %v681_v39 = vmul.f32 %v2239_v30, %v2501_v7  ;;  %v1313_v42 = vpack.c.bf16 %v2501_v7, %v2491_v53 }
 0x127   : > { %v2523_v49 = vadd.f32 %v713_v17, %v678_v10  ;;  %v2525_v60 = vadd.f32 %v715_v22, %v680_v5  ;;  %640 = vst.msk [vmem:[#allocation2 + $0x1b0] sm:$0xff] %vm567_vm1, %v2511_v31  ;;  %v679_v57 = vmul.f32 %v2239_v30, %v2511_v31  ;;  %v716_v1 = vmul.f32 %v2236_v29, %v2511_v31 }
 0x128   : > { %v1312_v12 = vpack.c.bf16 %v2511_v31, %v2494_v61  ;;  %v2538_v17 = vadd.f32 %v761_v32, %v2285_v9 }
 0x129   : > { %v2535_v2 = vadd.f32 %v714_v38, %v679_v57  ;;  %v748_v59 = vadd.f32 %v716_v1, %v681_v39  ;;  %v1869_v50 = vpop.f32.mrb[28].mxu0  ;;  %v764_v1 = vmul.f32 %v2242_v33, %v2318_v35 }
 0x12a   : > { %3405 = vst [vmem:[#allocation17_spill] sm:$0xff] %v2538_v17  ;;  %v2540_v5 = vmax.f32 %v1869_v50, 0.0  ;;  %1903 = vmatprep.mubr.msk.bf16.mxu1 %vm567_vm1, %v1312_v12  ;;  %v520_v10 = vpop.f32.mrb[29].mxu0  ;;  %v717_v50 = vmul.f32 %v2236_v29, %v2491_v53 }
 0x12b   : > { %3404 = vst [vmem:[#allocation16_spill] sm:$0xff] %v2535_v2  ;;  %v2543_v22 = vmax.f32 %v520_v10, 0.0  ;;  %1904 = vmatmul.mubr.msk.bf16.gmra.mrb[24].mxu1 %vm567_vm1, %v1313_v42  ;;  %v1870_v52 = vpop.f32.mrb[30].mxu0  ;;  %v762_v2 = vmul.f32 %v2242_v33, %v2272_v0 }
 0x12c   : > { %645 = vst.msk [vmem:[#allocation2 + $0x208] sm:$0xff] %vm567_vm1, %v2540_v5  ;;  %v684_v38 = vmul.f32 %v2239_v30, %v2540_v5  ;;  %v2550_v39 = vmax.f32 %v1870_v52, 0.0  ;;  %v523_v9 = vpop.f32.mrb[31].mxu0  ;;  %v718_v52 = vmul.f32 %v2236_v29, %v2501_v7 }
 0x12d   : > { %643 = vst.msk [vmem:[#allocation2 + $0x1e8] sm:$0xff] %vm567_vm1, %v2543_v22  ;;  %v682_v32 = vmul.f32 %v2239_v30, %v2543_v22  ;;  %v719_v42 = vmul.f32 %v2236_v29, %v2543_v22  ;;  %v564_v57 = vmax.f32 %v523_v9, 0.0 }
 0x12e   : > { %3406 = vst [vmem:[#allocation18_spill] sm:$0xff] %v2550_v39  ;;  %646 = vst.msk [vmem:[#allocation2 + $0x210] sm:$0xff] %vm567_vm1, %v2550_v39  ;;  %v685_v12 = vmul.f32 %v2239_v30, %v2550_v39  ;;  %v1315_v10 = vpack.c.bf16 %v2550_v39, %v2540_v5 }
 0x12f   : > { %v749_v17 = vadd.f32 %v717_v50, %v682_v32  ;;  %v2570_v14 = vadd.f32 %v719_v42, %v684_v38  ;;  %644 = vst.msk [vmem:[#allocation2 + $0x1f0] sm:$0xff] %vm567_vm1, %v564_v57  ;;  %v683_v9 = vmul.f32 %v2239_v30, %v564_v57  ;;  %v720_v35 = vmul.f32 %v2236_v29, %v564_v57 }
 0x130   : > { %v784_v28 = vmul.f32 %v2242_v33, %v564_v57  ;;  %v1314_v27 = vpack.c.bf16 %v564_v57, %v2543_v22  ;;  %v2585_v38 = vadd.f32 %v764_v1, %v2296_v16  ;;  %v767_v29 = vmul.f32 %v2242_v33, %v2351_v51  ;;  %v820_v1 = vld [vmem:[#allocation2 + $0x7] sm:$0xff] }
 0x131   : > { %3407 = vst [vmem:[#allocation19_spill] sm:$0xff] %v2570_v14  ;;  %v750_v26 = vadd.f32 %v718_v52, %v683_v9  ;;  %v2577_v24 = vadd.f32 %v720_v35, %v685_v12  ;;  %v2591_v30 = vadd.f32 %v762_v2, %v2294_v15  ;;  %v766_v16 = vmul.f32 %v2242_v33, %v2308_v23  ;;  %v822_v12 = vld [vmem:[#allocation2 + $0x27] sm:$0xff] }
 0x132   : > { %v2581_v39 = vadd.f32 %v784_v28, %v748_v59  ;;  %1907 = vmatprep.mubr.msk.bf16.mxu1 %vm567_vm1, %v1314_v27  ;;  %v2594_v50 = vadd.f32 %v767_v29, %v2331_v41  ;;  %v765_v28 = vmul.f32 %v2242_v33, %v2298_v18  ;;  %v768_v27 = vmul.f32 %v2242_v33, %v2368_v62  ;;  %v826_v9 = vld [vmem:[#allocation2 + $0x67] sm:$0xff] }
 0x133   : > { %3408 = vst [vmem:[#allocation20_spill] sm:$0xff] %v2577_v24  ;;  %1908 = vmatmul.mubr.msk.bf16.gmra.mrb[28].mxu1 %vm567_vm1, %v1315_v10  ;;  %v771_v15 = vmul.f32 %v2242_v33, %v2397_v19  ;;  %v2611_v41 = vadd.f32 %v766_v16, %v2341_v45  ;;  %v769_v51 = vmul.f32 %v2242_v33, %v2345_v48  ;;  %v821_v10 = vld [vmem:[#allocation2 + $0xf] sm:$0xff] }
 0x134   : > { %3409 = vst [vmem:[#allocation21_spill] sm:$0xff] %v2581_v39  ;;  %v2601_v59 = vadd.f32 %v765_v28, %v2329_v40  ;;  %v2604_v0 = vadd.f32 %v768_v27, %v2343_v46  ;;  %v772_v40 = vmul.f32 %v2242_v33, %v2414_v37  ;;  %v770_v62 = vmul.f32 %v2242_v33, %v2358_v56  ;;  %v824_v28 = vld [vmem:[#allocation2 + $0x47] sm:$0xff]  ;;  %v3420_v27 = vld [vmem:[#allocation9_spill] sm:$0xff] }
 0x135   : > { %v2614_v18 = vadd.f32 %v771_v15, %v2380_v4  ;;  %v2621_v46 = vadd.f32 %v769_v51, %v2378_v3  ;;  %v775_v45 = vmul.f32 %v2242_v33, %v2445_v63  ;;  %v773_v19 = vmul.f32 %v2242_v33, %v2394_v13  ;;  %v3421_v51 = vld [vmem:[#allocation13_spill] sm:$0xff] }
 0x136   : > { %v2624_v23 = vadd.f32 %v772_v40, %v2392_v11  ;;  %v2631_v4 = vadd.f32 %v770_v62, %v2390_v8  ;;  %v776_v3 = vmul.f32 %v2242_v33, %v2465_v21  ;;  %v774_v37 = vmul.f32 %v2242_v33, %v2404_v25 }
 0x137   : > { %v2634_v48 = vadd.f32 %v775_v45, %v2428_v47  ;;  %v2641_v11 = vadd.f32 %v773_v19, %v2426_v44  ;;  %v779_v8 = vmul.f32 %v2242_v33, %v2494_v61  ;;  %v777_v63 = vmul.f32 %v2242_v33, %v2442_v55  ;;  %v3412_v61 = vld [vmem:[#allocation16_spill] sm:$0xff]  ;;  %v3422_v45 = vld [vmem:[#allocation11_spill] sm:$0xff] }
 0x138   : > { %v2644_v56 = vadd.f32 %v776_v3, %v2440_v58  ;;  %v2651_v47 = vadd.f32 %v774_v37, %v2438_v54  ;;  %v780_v44 = vmul.f32 %v2242_v33, %v2511_v31  ;;  %v778_v2 = vmul.f32 %v2242_v33, %v2455_v6  ;;  %v2712_v3 = vld [vmem:[#allocation2 + $0x4f] sm:$0xff] }
 0x139   : > { %v2654_v13 = vadd.f32 %v779_v8, %v2477_v36  ;;  %v2661_v58 = vadd.f32 %v777_v63, %v2475_v34  ;;  %v783_v54 = vmul.f32 %v2242_v33, %v2543_v22  ;;  %v781_v36 = vmul.f32 %v2242_v33, %v2491_v53  ;;  %v3415_v22 = vld [vmem:[#allocation18_spill] sm:$0xff]  ;;  %v2714_v37 = vld [vmem:[#allocation2 + $0x6f] sm:$0xff] }
 0x13a   : > { %v2664_v25 = vadd.f32 %v780_v44, %v2489_v20  ;;  %v2671_v21 = vadd.f32 %v778_v2, %v2487_v43  ;;  %v782_v20 = vmul.f32 %v2242_v33, %v2501_v7  ;;  %v785_v31 = vmul.f32 %v2242_v33, %v2540_v5  ;;  %v3417_v53 = vld [vmem:[#allocation6_spill] sm:$0xff]  ;;  %v3419_v7 = vld [vmem:[#allocation8_spill] sm:$0xff] }
 0x13b   : > { %v2674_v55 = vadd.f32 %v783_v54, %v2525_v60  ;;  %v2679_v34 = vadd.f32 %v781_v36, %v2523_v49  ;;  %v786_v60 = vmul.f32 %v2242_v33, %v3415_v22  ;;  %v858_v42 = vsub.s32 0, %v3417_v53  ;;  %v3418_v49 = vld [vmem:[#allocation7_spill] sm:$0xff]  ;;  %v3423_v63 = vld [vmem:[#allocation14_spill] sm:$0xff] }
 0x13c   : > { %v2684_v6 = vadd.f32 %v782_v20, %v3412_v61  ;;  %v2688_v43 = vadd.f32 %v785_v31, %v749_v17  ;;  %v823_v17 = vld [vmem:[#allocation2 + $0x2f] sm:$0xff]  ;;  %v1098_v62 = vsub.s32 2, %v3417_v53  ;;  %v2722_v22 = vld [vmem:[#allocation2 + $0x87] sm:$0xff] }
 0x13d   : > { %3410 = vst [vmem:[#allocation22_spill] sm:$0xff] %v2674_v55  ;;  %3411 = vst [vmem:[#allocation23_spill] sm:$0xff] %v2679_v34  ;;  %v2692_v32 = vadd.f32 %v786_v60, %v750_v26  ;;  %v2696_v57 = vrot.slane %v3418_v49, %v858_v42  ;;  %v2699_v52 = vrot.slane %v3419_v7, %v858_v42  ;;  %v3424_v61 = vld [vmem:[#allocation12_spill] sm:$0xff]  ;;  %v2724_v60 = vld [vmem:[#allocation2 + $0xa7] sm:$0xff] }
 0x13e   : > { %3413 = vst [vmem:[#allocation16_spill] sm:$0xff] %v2684_v6  ;;  %3414 = vst [vmem:[#allocation24_spill] sm:$0xff] %v2688_v43  ;;  %v2706_v16 = vrot.slane %v3420_v27, %v858_v42  ;;  %v1060_v53 = vld [vmem:[#allocation2 + $0x9] sm:$0xff]  ;;  %v2749_v43 = vrot.slane %v3420_v27, %v1098_v62  ;;  %v2871_v55 = vld [vmem:[#allocation2 + $0xf1] sm:$0xff] }
 0x13f   : > { %3416 = vst [vmem:[#allocation18_spill] sm:$0xff] %v2692_v32  ;;  %v860_v5 = vmul.f32 %v2696_v57, %v820_v1  ;;  %v862_v35 = vmul.f32 %v2696_v57, %v822_v12  ;;  %v928_v26 = vmul.f32 %v2699_v52, %v822_v12  ;;  %v861_v29 = vmul.f32 %v2696_v57, %v821_v10  ;;  %v3425_v12 = vld [vmem:[#allocation15_spill] sm:$0xff] }
 0x140   : > { %v863_v15 = vmul.f32 %v2696_v57, %v823_v17  ;;  %v929_v8 = vmul.f32 %v2699_v52, %v823_v17  ;;  %v866_v2 = vmul.f32 %v2696_v57, %v826_v9  ;;  %v930_v54 = vmul.f32 %v2699_v52, %v824_v28 }
 0x141   : > { %v894_v40 = vadd.f32 %v862_v35, %v3421_v51  ;;  %v892_v19 = vadd.f32 %v860_v5, %v3422_v45  ;;  %v998_v36 = vmul.f32 %v2706_v16, %v826_v9  ;;  %v893_v31 = vadd.f32 %v861_v29, %v3424_v61  ;;  %v1062_v29 = vld [vmem:[#allocation2 + $0x29] sm:$0xff]  ;;  %v1061_v45 = vld [vmem:[#allocation2 + $0x11] sm:$0xff] }
 0x142   : > { %v895_v44 = vadd.f32 %v863_v15, %v3423_v63  ;;  %v931_v42 = vmul.f32 %v2699_v52, %v2712_v3  ;;  %v999_v1 = vmul.f32 %v2706_v16, %v2714_v37  ;;  %v898_v10 = vadd.f32 %v866_v2, %v3425_v12  ;;  %v1064_v61 = vld [vmem:[#allocation2 + $0x49] sm:$0xff] }
 0x143   : > { %v960_v20 = vadd.f32 %v928_v26, %v892_v19  ;;  %v962_v5 = vadd.f32 %v930_v54, %v894_v40  ;;  %v2732_v17 = vrot.slane %v3418_v49, %v1098_v62  ;;  %v996_v35 = vmul.f32 %v2706_v16, %v824_v28  ;;  %v1063_v54 = vld [vmem:[#allocation2 + $0x31] sm:$0xff]  ;;  %v1066_v12 = vld [vmem:[#allocation2 + $0x69] sm:$0xff] }
 0x144   : > { %v961_v26 = vadd.f32 %v929_v8, %v893_v31  ;;  %v2736_v15 = vrot.slane %v3419_v7, %v1098_v62  ;;  %v963_v51 = vadd.f32 %v931_v42, %v895_v44  ;;  %v934_v19 = vmul.f32 %v2699_v52, %v2722_v22 }
 0x145   : > { %v1002_v63 = vmul.f32 %v2706_v16, %v2724_v60  ;;  %v1030_v2 = vadd.f32 %v998_v36, %v962_v5  ;;  %v1028_v40 = vadd.f32 %v996_v35, %v960_v20  ;;  %v1100_v49 = vmul.f32 %v2732_v17, %v1060_v53  ;;  %v3426_v35 = vld [vmem:[#allocation17_spill] sm:$0xff] }
 0x146   : > { %v997_v8 = vmul.f32 %v2706_v16, %v2712_v3  ;;  %v1031_v31 = vadd.f32 %v999_v1, %v963_v51  ;;  %v966_v7 = vadd.f32 %v934_v19, %v898_v10  ;;  %v864_v44 = vmul.f32 %v2696_v57, %v824_v28  ;;  %v2755_v28 = vld [vmem:[#allocation2 + $0x51] sm:$0xff] }
 0x147   : > { %v932_v42 = vmul.f32 %v2699_v52, %v826_v9  ;;  %v1102_v32 = vmul.f32 %v2732_v17, %v1062_v29  ;;  %v1101_v20 = vmul.f32 %v2732_v17, %v1061_v45  ;;  %v1103_v53 = vmul.f32 %v2732_v17, %v1063_v54  ;;  %v2762_v45 = vld [vmem:[#allocation2 + $0xaf] sm:$0xff] }
 0x148   : > { %v1029_v36 = vadd.f32 %v997_v8, %v961_v26  ;;  %v1034_v5 = vadd.f32 %v1002_v63, %v966_v7  ;;  %v896_v24 = vadd.f32 %v864_v44, %v3426_v35  ;;  %v1170_v10 = vmul.f32 %v2736_v15, %v1064_v61  ;;  %v2760_v26 = vld [vmem:[#allocation2 + $0x8f] sm:$0xff] }
 0x149   : > { %v1134_v1 = vadd.f32 %v1102_v32, %v1030_v2  ;;  %v867_v9 = vmul.f32 %v2696_v57, %v2714_v37  ;;  %v1132_v51 = vadd.f32 %v1100_v49, %v1028_v40  ;;  %v1135_v19 = vadd.f32 %v1103_v53, %v1031_v31  ;;  %v2766_v8 = vld [vmem:[#allocation2 + $0x89] sm:$0xff] }
 0x14a   : > { %v1106_v27 = vmul.f32 %v2732_v17, %v1066_v12  ;;  %v964_v62 = vadd.f32 %v932_v42, %v896_v24  ;;  %v1168_v63 = vmul.f32 %v2736_v15, %v1062_v29  ;;  %v1236_v32 = vmul.f32 %v2749_v43, %v1064_v61  ;;  %v1067_v42 = vld [vmem:[#allocation2 + $0x71] sm:$0xff] }
 0x14b   : > { %v1133_v2 = vadd.f32 %v1101_v20, %v1029_v36  ;;  %v899_v7 = vadd.f32 %v867_v9, %v2585_v38  ;;  %v1238_v44 = vmul.f32 %v2749_v43, %v1066_v12  ;;  %v1171_v40 = vmul.f32 %v2736_v15, %v2755_v28 }
 0x14c   : > { %v1138_v49 = vadd.f32 %v1106_v27, %v1034_v5  ;;  %v1000_v24 = vmul.f32 %v2706_v16, %v2722_v22  ;;  %v1202_v31 = vadd.f32 %v1170_v10, %v1134_v1  ;;  %v1169_v29 = vmul.f32 %v2736_v15, %v1063_v54  ;;  %v1070_v27 = vld [vmem:[#allocation2 + $0xa9] sm:$0xff] }
 0x14d   : > { %v935_v36 = vmul.f32 %v2699_v52, %v2760_v26  ;;  %v1003_v20 = vmul.f32 %v2706_v16, %v2762_v45  ;;  %v1200_v38 = vadd.f32 %v1168_v63, %v1132_v51  ;;  %v1203_v53 = vadd.f32 %v1171_v40, %v1135_v19 }
 0x14e   : > { %v1174_v35 = vmul.f32 %v2736_v15, %v2766_v8  ;;  %v1032_v9 = vadd.f32 %v1000_v24, %v964_v62  ;;  %v1201_v5 = vadd.f32 %v1169_v29, %v1133_v2  ;;  %v865_v1 = vmul.f32 %v2696_v57, %v2712_v3  ;;  %v832_v3 = vld [vmem:[#allocation2 + $0xc7] sm:$0xff]  ;;  %v2797_v24 = vld [vmem:[#allocation2 + $0x91] sm:$0xff] }
 0x14f   : > { %v967_v14 = vadd.f32 %v935_v36, %v899_v7  ;;  %v933_v54 = vmul.f32 %v2699_v52, %v2714_v37  ;;  %v1239_v10 = vmul.f32 %v2749_v43, %v1067_v42  ;;  %v1104_v33 = vmul.f32 %v2732_v17, %v1064_v61  ;;  %v834_v7 = vld [vmem:[#allocation2 + $0xe7] sm:$0xff] }
 0x150   : > { %v1206_v6 = vadd.f32 %v1174_v35, %v1138_v49  ;;  %v870_v51 = vmul.f32 %v2696_v57, %v2724_v60  ;;  %v2789_v19 = vadd.f32 %v1238_v44, %v1202_v31  ;;  %v1237_v62 = vmul.f32 %v2749_v43, %v2755_v28 }
 0x151   : > { %v1035_v63 = vadd.f32 %v1003_v20, %v967_v14  ;;  %v897_v2 = vadd.f32 %v865_v1, %v2591_v30  ;;  %v2794_v40 = vadd.f32 %v1236_v32, %v1200_v38  ;;  %v1242_v37 = vmul.f32 %v2749_v43, %v1070_v27  ;;  %v2808_v32 = vld [vmem:[#allocation2 + $0xb1] sm:$0xff] }
 0x152   : > { %v1136_v49 = vadd.f32 %v1104_v33, %v1032_v9  ;;  %v902_v61 = vadd.f32 %v870_v51, %v2594_v50  ;;  %v2800_v29 = vadd.f32 %v1239_v10, %v1203_v53  ;;  %v2802_v44 = vadd.f32 %v1237_v62, %v1201_v5  ;;  %v2818_v5 = vld [vmem:[#allocation2 + $0xc9] sm:$0xff] }
 0x153   : > { %v1107_v31 = vmul.f32 %v2732_v17, %v1067_v42  ;;  %v965_v14 = vadd.f32 %v933_v54, %v897_v2  ;;  %v2805_v36 = vadd.f32 %v1242_v37, %v1206_v6  ;;  %v1172_v30 = vmul.f32 %v2736_v15, %v1066_v12  ;;  %v2820_v12 = vld [vmem:[#allocation2 + $0xe9] sm:$0xff] }
 0x154   : > { %v938_v20 = vmul.f32 %v2699_v52, %v832_v3  ;;  %v1006_v33 = vmul.f32 %v2706_v16, %v834_v7  ;;  %v1240_v50 = vmul.f32 %v2749_v43, %v2766_v8  ;;  %v1175_v53 = vmul.f32 %v2736_v15, %v2797_v24 }
 0x155   : > { %v1139_v38 = vadd.f32 %v1107_v31, %v1035_v63  ;;  %v1001_v35 = vmul.f32 %v2706_v16, %v2760_v26  ;;  %v1204_v6 = vadd.f32 %v1172_v30, %v1136_v49  ;;  %v868_v1 = vmul.f32 %v2696_v57, %v2722_v22 }
 0x156   : > { %v970_v9 = vadd.f32 %v938_v20, %v902_v61  ;;  %v936_v54 = vmul.f32 %v2699_v52, %v2724_v60  ;;  %v1243_v10 = vmul.f32 %v2749_v43, %v2808_v32  ;;  %v1105_v62 = vmul.f32 %v2732_v17, %v2755_v28 }
 0x157   : > { %v1033_v51 = vadd.f32 %v1001_v35, %v965_v14  ;;  %v1173_v63 = vmul.f32 %v2736_v15, %v1067_v42  ;;  %v1241_v2 = vmul.f32 %v2749_v43, %v2797_v24  ;;  %v900_v49 = vadd.f32 %v868_v1, %v2601_v59  ;;  %v833_v14 = vld [vmem:[#allocation2 + $0xcf] sm:$0xff] }
 0x158   : > { %v1038_v37 = vadd.f32 %v1006_v33, %v970_v9  ;;  %v871_v22 = vmul.f32 %v2696_v57, %v2762_v45  ;;  %v1207_v61 = vadd.f32 %v1175_v53, %v1139_v38  ;;  %v1110_v60 = vmul.f32 %v2732_v17, %v1070_v27  ;;  %v835_v42 = vld [vmem:[#allocation2 + $0xef] sm:$0xff] }
 0x159   : > { %v1178_v31 = vmul.f32 %v2736_v15, %v2818_v5  ;;  %v1246_v28 = vmul.f32 %v2749_v43, %v2820_v12  ;;  %v2841_v30 = vadd.f32 %v1240_v50, %v1204_v6  ;;  %v968_v20 = vadd.f32 %v936_v54, %v900_v49 }
 0x15a   : > { %v1004_v33 = vmul.f32 %v2706_v16, %v832_v3  ;;  %v903_v59 = vadd.f32 %v871_v22, %v2604_v0  ;;  %v1137_v35 = vadd.f32 %v1105_v62, %v1033_v51  ;;  %v1108_v38 = vmul.f32 %v2732_v17, %v2766_v8  ;;  %v2858_v51 = vld [vmem:[#allocation2 + $0xd1] sm:$0xff] }
 0x15b   : > { %v869_v53 = vmul.f32 %v2696_v57, %v2760_v26  ;;  %v937_v9 = vmul.f32 %v2699_v52, %v2762_v45  ;;  %v1142_v1 = vadd.f32 %v1110_v60, %v1038_v37  ;;  %v1176_v39 = vmul.f32 %v2736_v15, %v1070_v27  ;;  %v2862_v37 = vld [vmem:[#allocation2 + $0x107] sm:$0xff] }
 0x15c   : > { %v939_v50 = vmul.f32 %v2699_v52, %v833_v14  ;;  %v1007_v6 = vmul.f32 %v2706_v16, %v835_v42  ;;  %v2854_v54 = vadd.f32 %v1243_v10, %v1207_v61  ;;  %v1244_v0 = vmul.f32 %v2749_v43, %v2818_v5  ;;  %v2864_v27 = vld [vmem:[#allocation2 + $0x127] sm:$0xff] }
 0x15d   : > { %v901_v8 = vadd.f32 %v869_v53, %v2611_v41  ;;  %v874_v26 = vmul.f32 %v2696_v57, %v834_v7  ;;  %v1036_v62 = vadd.f32 %v1004_v33, %v968_v20  ;;  %v872_v49 = vmul.f32 %v2696_v57, %v832_v3 }
 0x15e   : > { %v971_v45 = vadd.f32 %v939_v50, %v903_v59  ;;  %v940_v10 = vmul.f32 %v2699_v52, %v834_v7  ;;  %v1205_v22 = vadd.f32 %v1173_v63, %v1137_v35  ;;  %v1111_v61 = vmul.f32 %v2732_v17, %v2808_v32  ;;  %v2882_v35 = vld [vmem:[#allocation2 + $0x10f] sm:$0xff] }
 0x15f   : > { %v969_v60 = vadd.f32 %v937_v9, %v901_v8  ;;  %v906_v34 = vadd.f32 %v874_v26, %v2614_v18  ;;  %v1210_v41 = vadd.f32 %v1178_v31, %v1142_v1  ;;  %v1179_v20 = vmul.f32 %v2736_v15, %v2858_v51  ;;  %v2884_v9 = vld [vmem:[#allocation2 + $0x12f] sm:$0xff] }
 0x160   : > { %v1039_v53 = vadd.f32 %v1007_v6, %v971_v45  ;;  %v904_v33 = vadd.f32 %v872_v49, %v2621_v46  ;;  %v1005_v3 = vmul.f32 %v2706_v16, %v833_v14  ;;  %v942_v7 = vmul.f32 %v2699_v52, %v2862_v37 }
 0x161   : > { %v1010_v63 = vmul.f32 %v2706_v16, %v2864_v27  ;;  %v875_v59 = vmul.f32 %v2696_v57, %v835_v42  ;;  %v1140_v18 = vadd.f32 %v1108_v38, %v1036_v62  ;;  %v873_v1 = vmul.f32 %v2696_v57, %v833_v14 }
 0x162   : > { %v972_v31 = vadd.f32 %v940_v10, %v904_v33  ;;  %v941_v46 = vmul.f32 %v2699_v52, %v835_v42  ;;  %v1247_v50 = vmul.f32 %v2749_v43, %v2871_v55  ;;  %v1037_v6 = vadd.f32 %v1005_v3, %v969_v60 }
 0x163   : > { %v974_v8 = vadd.f32 %v942_v7, %v906_v34  ;;  %v907_v26 = vadd.f32 %v875_v59, %v2624_v23  ;;  %v2891_v45 = vadd.f32 %v1241_v2, %v1205_v22  ;;  %v1143_v49 = vadd.f32 %v1111_v61, %v1039_v53  ;;  %v2904_v53 = vld [vmem:[#allocation2 + $0x109] sm:$0xff] }
 0x164   : > { %v1008_v38 = vmul.f32 %v2706_v16, %v2862_v37  ;;  %v905_v62 = vadd.f32 %v873_v1, %v2631_v4  ;;  %v1109_v14 = vmul.f32 %v2732_v17, %v2797_v24  ;;  %v943_v42 = vmul.f32 %v2699_v52, %v2882_v35 }
 0x165   : > { %v1042_v10 = vadd.f32 %v1010_v63, %v974_v8  ;;  %v1011_v34 = vmul.f32 %v2706_v16, %v2884_v9  ;;  %v2902_v60 = vadd.f32 %v1246_v28, %v1210_v41  ;;  %v1208_v23 = vadd.f32 %v1176_v39, %v1140_v18  ;;  %v2916_v41 = vld [vmem:[#allocation2 + $0x147] sm:$0xff] }
 0x166   : > { %v1040_v2 = vadd.f32 %v1008_v38, %v972_v31  ;;  %v973_v22 = vadd.f32 %v941_v46, %v905_v62  ;;  %v1141_v61 = vadd.f32 %v1109_v14, %v1037_v6  ;;  %v1114_v4 = vmul.f32 %v2732_v17, %v2820_v12  ;;  %v2918_v63 = vld [vmem:[#allocation2 + $0x167] sm:$0xff]  ;;  %v2938_v14 = vld [vmem:[#allocation2 + $0x111] sm:$0xff] }
 0x167   : > { %v975_v33 = vadd.f32 %v943_v42, %v907_v26  ;;  %v878_v24 = vmul.f32 %v2696_v57, %v2864_v27  ;;  %v1211_v3 = vadd.f32 %v1179_v20, %v1143_v49  ;;  %v1177_v7 = vmul.f32 %v2736_v15, %v2808_v32  ;;  %v1078_v18 = vld [vmem:[#allocation2 + $0x129] sm:$0xff] }
 0x168   : > { %v1112_v28 = vmul.f32 %v2732_v17, %v2818_v5  ;;  %v1009_v39 = vmul.f32 %v2706_v16, %v2882_v35  ;;  %v1245_v59 = vmul.f32 %v2749_v43, %v2858_v51  ;;  %v1146_v31 = vadd.f32 %v1114_v4, %v1042_v10  ;;  %v2940_v10 = vld [vmem:[#allocation2 + $0x131] sm:$0xff]  ;;  %v2946_v4 = vld [vmem:[#allocation2 + $0x149] sm:$0xff] }
 0x169   : > { %v1043_v1 = vadd.f32 %v1011_v34, %v975_v33  ;;  %v910_v20 = vadd.f32 %v878_v24, %v2634_v48  ;;  %v2923_v46 = vadd.f32 %v1244_v0, %v1208_v23  ;;  %v1182_v32 = vmul.f32 %v2736_v15, %v2904_v53 }
 0x16a   : > { %v1144_v5 = vadd.f32 %v1112_v28, %v1040_v2  ;;  %v1041_v6 = vadd.f32 %v1009_v39, %v973_v22  ;;  %v1209_v8 = vadd.f32 %v1177_v7, %v1141_v61  ;;  %v1115_v26 = vmul.f32 %v2732_v17, %v2871_v55 }
 0x16b   : > { %v946_v49 = vmul.f32 %v2699_v52, %v2916_v41  ;;  %v1014_v38 = vmul.f32 %v2706_v16, %v2918_v63  ;;  %v2933_v62 = vadd.f32 %v1247_v50, %v1211_v3  ;;  %v1250_v48 = vmul.f32 %v2749_v43, %v1078_v18 }
 0x16c   : > { %v1180_v0 = vmul.f32 %v2736_v15, %v2820_v12  ;;  %v1113_v42 = vmul.f32 %v2732_v17, %v2858_v51  ;;  %v1214_v34 = vadd.f32 %v1182_v32, %v1146_v31  ;;  %v1248_v23 = vmul.f32 %v2749_v43, %v2904_v53 }
 0x16d   : > { %v1147_v2 = vadd.f32 %v1115_v26, %v1043_v1  ;;  %v978_v22 = vadd.f32 %v946_v49, %v910_v20  ;;  %v876_v12 = vmul.f32 %v2696_v57, %v2862_v37  ;;  %v944_v33 = vmul.f32 %v2699_v52, %v2864_v27  ;;  %v2962_v37 = vld [vmem:[#allocation2 + $0x169] sm:$0xff] }
 0x16e   : > { %v1212_v50 = vadd.f32 %v1180_v0, %v1144_v5  ;;  %v1145_v61 = vadd.f32 %v1113_v42, %v1041_v6  ;;  %v2952_v24 = vadd.f32 %v1245_v59, %v1209_v8  ;;  %v1183_v51 = vmul.f32 %v2736_v15, %v2938_v14  ;;  %v2972_v5 = vld [vmem:[#allocation2 + $0x14f] sm:$0xff] }
 0x16f   : > { %v1251_v3 = vmul.f32 %v2749_v43, %v2940_v10  ;;  %v1046_v7 = vadd.f32 %v1014_v38, %v978_v22  ;;  %v1181_v28 = vmul.f32 %v2736_v15, %v2871_v55  ;;  %v1249_v39 = vmul.f32 %v2749_v43, %v2938_v14  ;;  %v2974_v55 = vld [vmem:[#allocation2 + $0x16f] sm:$0xff] }
 0x170   : > { %v908_v27 = vadd.f32 %v876_v12, %v2641_v11  ;;  %v879_v59 = vmul.f32 %v2696_v57, %v2884_v9  ;;  %v2967_v31 = vadd.f32 %v1250_v48, %v1214_v34  ;;  %v1215_v1 = vadd.f32 %v1183_v51, %v1147_v2  ;;  %v2994_v2 = vld [vmem:[#allocation2 + $0x151] sm:$0xff] }
 0x171   : > { %v1118_v20 = vmul.f32 %v2732_v17, %v1078_v18  ;;  %v1186_v32 = vmul.f32 %v2736_v15, %v2946_v4  ;;  %v2976_v6 = vadd.f32 %v1248_v23, %v1212_v50  ;;  %v1213_v8 = vadd.f32 %v1181_v28, %v1145_v61  ;;  %v2996_v22 = vld [vmem:[#allocation2 + $0x171] sm:$0xff] }
 0x172   : > { %v976_v26 = vadd.f32 %v944_v33, %v908_v27  ;;  %v911_v11 = vadd.f32 %v879_v59, %v2644_v56  ;;  %v1254_v38 = vmul.f32 %v2749_v43, %v2962_v37  ;;  %v877_v48 = vmul.f32 %v2696_v57, %v2882_v35 }
 0x173   : > { %v1150_v49 = vadd.f32 %v1118_v20, %v1046_v7  ;;  %v945_v0 = vmul.f32 %v2699_v52, %v2884_v9  ;;  %v1012_v42 = vmul.f32 %v2706_v16, %v2916_v41  ;;  %v1116_v34 = vmul.f32 %v2732_v17, %v2904_v53 }
 0x174   : > { %v947_v56 = vmul.f32 %v2699_v52, %v2972_v5  ;;  %v1015_v23 = vmul.f32 %v2706_v16, %v2974_v55  ;;  %v2998_v35 = vadd.f32 %v1251_v3, %v1215_v1  ;;  %v1184_v9 = vmul.f32 %v2736_v15, %v1078_v18 }
 0x175   : > { %v3003_v50 = vmul.f32 %v2749_v43, %v2946_v4  ;;  %v909_v53 = vadd.f32 %v877_v48, %v2651_v47  ;;  %v3010_v61 = vadd.f32 %v1249_v39, %v1213_v8  ;;  %v1044_v12 = vadd.f32 %v1012_v42, %v976_v26 }
 0x176   : > { %v979_v33 = vadd.f32 %v947_v56, %v911_v11  ;;  %v1119_v51 = vmul.f32 %v2732_v17, %v2940_v10  ;;  %v1218_v7 = vadd.f32 %v1186_v32, %v1150_v49  ;;  %v1187_v18 = vmul.f32 %v2736_v15, %v2994_v2  ;;  %v3028_v11 = vld [vmem:[#allocation2 + $0x187] sm:$0xff] }
 0x177   : > { %v3018_v28 = vmul.f32 %v2749_v43, %v2996_v22  ;;  %v977_v47 = vadd.f32 %v945_v0, %v909_v53  ;;  %v1013_v1 = vmul.f32 %v2706_v16, %v2972_v5  ;;  %v882_v20 = vmul.f32 %v2696_v57, %v2918_v63  ;;  %v3030_v49 = vld [vmem:[#allocation2 + $0x1a7] sm:$0xff] }
 0x178   : > { %v1047_v39 = vadd.f32 %v1015_v23, %v979_v33  ;;  %v1117_v26 = vmul.f32 %v2732_v17, %v2938_v14  ;;  %v948_v48 = vmul.f32 %v2699_v52, %v2918_v63 }
 0x179   : > { %v914_v23 = vadd.f32 %v882_v20, %v2654_v13  ;;  %v1045_v33 = vadd.f32 %v1013_v1, %v977_v47  ;;  %v1018_v13 = vmul.f32 %v2706_v16, %v3030_v49  ;;  %v883_v47 = vmul.f32 %v2696_v57, %v2974_v55  ;;  %v3063_v1 = vld [vmem:[#allocation2 + $0x18f] sm:$0xff] }
 0x17a   : > { %v1151_v63 = vadd.f32 %v1119_v51, %v1047_v39 }
 0x17b   : > { %v1149_v20 = vadd.f32 %v1117_v26, %v1045_v33  ;;  %v881_v33 = vmul.f32 %v2696_v57, %v2972_v5 }
 0x1ce   : > { %v1881_v3 = vpop.f32.mrb[0].mxu1 }
 0x1cf   : > { %v1559_v27 = vadd.f32 %v1881_v3, %v2789_v19  ;;  %v1430_v59 = vpop.f32.mrb[1].mxu1  ;;  %v880_v19 = vmul.f32 %v2696_v57, %v2916_v41 }
 0x1d0   : > { %v1557_v32 = vadd.f32 %v1430_v59, %v2794_v40  ;;  %v1882_v8 = vpop.f32.mrb[2].mxu1  ;;  %v1148_v40 = vadd.f32 %v1116_v34, %v1044_v12  ;;  %v3053_v34 = vld [vmem:[#allocation2 + $0x189] sm:$0xff]  ;;  %v1253_v59 = vmul.f32 %v2749_v43, %v2994_v2 }
 0x1d1   : > { %v1591_v0 = vmax.f32 %v1559_v27, 0.0  ;;  %v1560_v42 = vadd.f32 %v1882_v8, %v2800_v29  ;;  %v1433_v56 = vpop.f32.mrb[3].mxu1  ;;  %v912_v3 = vadd.f32 %v880_v19, %v2661_v58  ;;  %v950_v29 = vmul.f32 %v2699_v52, %v3028_v11 }
 0x1d2   : > { %v1589_v53 = vmax.f32 %v1557_v32, 0.0  ;;  %v1558_v14 = vadd.f32 %v1433_v56, %v2802_v44  ;;  %v3051_v58 = vadd.f32 %v1254_v38, %v1218_v7  ;;  %v1216_v51 = vadd.f32 %v1184_v9, %v1148_v40  ;;  %v3065_v38 = vld [vmem:[#allocation2 + $0x1af] sm:$0xff] }
 0x1d3   : > { %1623 = vst.msk [vmem:[%s3041_s9 + $0x10] sm:$0xff] %vm567_vm1, %v1591_v0  ;;  %v1592_v41 = vmax.f32 %v1560_v42, 0.0  ;;  %v980_v12 = vadd.f32 %v948_v48, %v912_v3  ;;  %v1185_v27 = vmul.f32 %v2736_v15, %v2940_v10  ;;  %v982_v39 = vadd.f32 %v950_v29, %v914_v23 }
 0x1d4   : > { %1621 = vst.msk [vmem:[%s3041_s9] sm:$0xff] %vm567_vm1, %v1589_v53  ;;  %v1590_v44 = vmax.f32 %v1558_v14, 0.0  ;;  %v1122_v32 = vmul.f32 %v2732_v17, %v2962_v37  ;;  %v1016_v9 = vmul.f32 %v2706_v16, %v3028_v11  ;;  %v915_v10 = vadd.f32 %v883_v47, %v2664_v25  ;;  %v3083_v14 = vld [vmem:[#allocation2 + $0x1a9] sm:$0xff] }
 0x1d5   : > { %1624 = vst.msk [vmem:[%s3041_s9 + $0x18] sm:$0xff] %vm567_vm1, %v1592_v41  ;;  %v1219_v48 = vadd.f32 %v1187_v18, %v1151_v63  ;;  %v1050_v0 = vadd.f32 %v1018_v13, %v982_v39  ;;  %v1190_v42 = vmul.f32 %v2736_v15, %v3053_v34  ;;  %v951_v23 = vmul.f32 %v2699_v52, %v3063_v1 }
 0x1d6   : > { %1622 = vst.msk [vmem:[%s3041_s9 + $0x8] sm:$0xff] %vm567_vm1, %v1590_v44  ;;  %v1885_v7 = vpop.f32.mrb[4].mxu1  ;;  %v1048_v40 = vadd.f32 %v1016_v9, %v980_v12  ;;  %v1019_v53 = vmul.f32 %v2706_v16, %v3065_v38  ;;  %v1217_v63 = vadd.f32 %v1185_v27, %v1149_v20  ;;  %v1120_v44 = vmul.f32 %v2732_v17, %v2946_v4  ;;  %v3102_v27 = vld [vmem:[#allocation2 + $0x191] sm:$0xff] }
 0x1d7   : > { %v1563_v8 = vadd.f32 %v1885_v7, %v2805_v36  ;;  %v1446_v19 = vpop.f32.mrb[5].mxu1  ;;  %v983_v29 = vadd.f32 %v951_v23, %v915_v10  ;;  %v913_v12 = vadd.f32 %v881_v33, %v2671_v21  ;;  %v3107_v39 = vadd.f32 %v3018_v28, %v1219_v48  ;;  %v3111_v7 = vld [vmem:[#allocation2 + $0x1b1] sm:$0xff]  ;;  %v3128_v48 = vld [vmem:[#allocation2 + $0x1c7] sm:$0xff] }
 0x1d8   : > { %v1561_v56 = vadd.f32 %v1446_v19, %v2841_v30  ;;  %v1886_v26 = vpop.f32.mrb[6].mxu1  ;;  %v949_v30 = vmul.f32 %v2699_v52, %v2974_v55  ;;  %v3098_v55 = vadd.f32 %v3003_v50, %v1216_v51  ;;  %v1152_v4 = vadd.f32 %v1120_v44, %v1048_v40  ;;  %v3427_v23 = vld [vmem:[#allocation22_spill] sm:$0xff] }
 0x1d9   : > { %v1595_v25 = vmax.f32 %v1563_v8, 0.0  ;;  %v1564_v36 = vadd.f32 %v1886_v26, %v2854_v54  ;;  %v1449_v18 = vpop.f32.mrb[7].mxu1  ;;  %v1154_v54 = vadd.f32 %v1122_v32, %v1050_v0  ;;  %v1051_v47 = vadd.f32 %v1019_v53, %v983_v29  ;;  %v3130_v0 = vld [vmem:[#allocation2 + $0x1e7] sm:$0xff] }
 0x1da   : > { %v1593_v3 = vmax.f32 %v1561_v56, 0.0  ;;  %v1562_v41 = vadd.f32 %v1449_v18, %v2891_v45  ;;  %v1258_v45 = vmul.f32 %v2749_v43, %v3083_v14  ;;  %v1188_v21 = vmul.f32 %v2736_v15, %v2962_v37 }
 0x1db   : > { %1627 = vst.msk [vmem:[%s3041_s9 + $0x30] sm:$0xff] %vm567_vm1, %v1595_v25  ;;  %v1596_v13 = vmax.f32 %v1564_v36, 0.0  ;;  %v981_v20 = vadd.f32 %v949_v30, %v913_v12  ;;  %v3115_v51 = vadd.f32 %v1253_v59, %v1217_v63  ;;  %v1256_v32 = vmul.f32 %v2749_v43, %v3053_v34  ;;  %v3142_v63 = vld [vmem:[#allocation2 + $0x1c9] sm:$0xff] }
 0x1dc   : > { %1625 = vst.msk [vmem:[%s3041_s9 + $0x20] sm:$0xff] %vm567_vm1, %v1593_v3  ;;  %v1594_v5 = vmax.f32 %v1562_v41, 0.0  ;;  %v1123_v9 = vmul.f32 %v2732_v17, %v2996_v22  ;;  %v886_v28 = vmul.f32 %v2696_v57, %v3030_v49  ;;  %v1222_v8 = vadd.f32 %v1190_v42, %v1154_v54  ;;  %v3152_v54 = vld [vmem:[#allocation2 + $0x1e9] sm:$0xff] }
 0x1dd   : > { %1628 = vst.msk [vmem:[%s3041_s9 + $0x38] sm:$0xff] %vm567_vm1, %v1596_v13  ;;  %v1191_v19 = vmul.f32 %v2736_v15, %v3102_v27  ;;  %v1017_v59 = vmul.f32 %v2706_v16, %v3063_v1  ;;  %v1220_v18 = vadd.f32 %v1188_v21, %v1152_v4  ;;  %v1022_v41 = vmul.f32 %v2706_v16, %v3130_v0 }
 0x1de   : > { %1626 = vst.msk [vmem:[%s3041_s9 + $0x28] sm:$0xff] %vm567_vm1, %v1594_v5  ;;  %v1889_v50 = vpop.f32.mrb[8].mxu1  ;;  %v1155_v40 = vadd.f32 %v1123_v9, %v1051_v47  ;;  %v918_v42 = vadd.f32 %v886_v28, %v3427_v23  ;;  %v1121_v13 = vmul.f32 %v2732_v17, %v2994_v2  ;;  %v1257_v5 = vmul.f32 %v2749_v43, %v3102_v27 }
 0x1df   : > { %v1567_v10 = vadd.f32 %v1889_v50, %v2902_v60  ;;  %v1462_v37 = vpop.f32.mrb[9].mxu1  ;;  %v1259_v60 = vmul.f32 %v2749_v43, %v3111_v7  ;;  %v1049_v33 = vadd.f32 %v1017_v59, %v981_v20  ;;  %v1126_v2 = vmul.f32 %v2732_v17, %v3083_v14 }
 0x1e0   : > { %v1565_v56 = vadd.f32 %v1462_v37, %v2923_v46  ;;  %v1890_v26 = vpop.f32.mrb[10].mxu1  ;;  %v954_v46 = vmul.f32 %v2699_v52, %v3128_v48  ;;  %v1223_v12 = vadd.f32 %v1191_v19, %v1155_v40  ;;  %v3170_v50 = vmul.f32 %v2749_v43, %v3152_v54 }
 0x1e1   : > { %v1599_v53 = vmax.f32 %v1567_v10, 0.0  ;;  %v1568_v25 = vadd.f32 %v1890_v26, %v2933_v62  ;;  %v1465_v36 = vpop.f32.mrb[11].mxu1  ;;  %v3146_v62 = vadd.f32 %v1258_v45, %v1222_v8  ;;  %v3160_v45 = vadd.f32 %v1256_v32, %v1220_v18  ;;  %v3429_v18 = vld [vmem:[#allocation21_spill] sm:$0xff] }
 0x1e2   : > { %v1597_v30 = vmax.f32 %v1565_v56, 0.0  ;;  %v1566_v3 = vadd.f32 %v1465_v36, %v2952_v24  ;;  %v1189_v24 = vmul.f32 %v2736_v15, %v2996_v22  ;;  %v986_v47 = vadd.f32 %v954_v46, %v918_v42 }
 0x1e3   : > { %1631 = vst.msk [vmem:[%s3041_s9 + $0x50] sm:$0xff] %vm567_vm1, %v1599_v53  ;;  %v1600_v29 = vmax.f32 %v1568_v25, 0.0  ;;  %v1153_v4 = vadd.f32 %v1121_v13, %v1049_v33  ;;  %v1194_v22 = vmul.f32 %v2736_v15, %v3142_v63  ;;  %v884_v9 = vmul.f32 %v2696_v57, %v3028_v11  ;;  %v851_v53 = vld [vmem:[#allocation2 + $0x1ef] sm:$0xff] }
 0x1e4   : > { %1629 = vst.msk [vmem:[%s3041_s9 + $0x40] sm:$0xff] %vm567_vm1, %v1597_v30  ;;  %v1598_v44 = vmax.f32 %v1566_v3, 0.0  ;;  %v1054_v20 = vadd.f32 %v1022_v41, %v986_v47  ;;  %v952_v32 = vmul.f32 %v2699_v52, %v3030_v49  ;;  %v1020_v37 = vmul.f32 %v2706_v16, %v3128_v48  ;;  %v3428_v49 = vld [vmem:[#allocation23_spill] sm:$0xff]  ;;  %v3200_v30 = vld [vmem:[#allocation2 + $0x1d1] sm:$0xff] }
 0x1e5   : > { %1632 = vst.msk [vmem:[%s3041_s9 + $0x58] sm:$0xff] %vm567_vm1, %v1600_v29  ;;  %v3181_v8 = vmul.f32 %v2732_v17, %v3053_v34  ;;  %v3185_v19 = vmul.f32 %v2736_v15, %v3083_v14  ;;  %v3188_v56 = vadd.f32 %v1259_v60, %v1223_v12  ;;  %v887_v26 = vmul.f32 %v2696_v57, %v3065_v38  ;;  %v3204_v3 = vld [vmem:[#allocation2 + $0x1f1] sm:$0xff]  ;;  %v3430_v29 = vld [vmem:[#allocation10_spill] sm:$0xff] }
 0x1e6   : > { %1630 = vst.msk [vmem:[%s3041_s9 + $0x48] sm:$0xff] %vm567_vm1, %v1598_v44  ;;  %v1893_v21 = vpop.f32.mrb[12].mxu1  ;;  %v1221_v42 = vadd.f32 %v1189_v24, %v1153_v4  ;;  %v3196_v14 = vmul.f32 %v2749_v43, %v3142_v63  ;;  %v1158_v36 = vadd.f32 %v1126_v2, %v1054_v20  ;;  %v885_v46 = vmul.f32 %v2696_v57, %v3063_v1 }
 0x1e7   : > { %v1571_v28 = vadd.f32 %v1893_v21, %v2967_v31  ;;  %v1478_v10 = vpop.f32.mrb[13].mxu1  ;;  %v916_v31 = vadd.f32 %v884_v9, %v3428_v49  ;;  %v919_v33 = vadd.f32 %v887_v26, %v3429_v18  ;;  %v953_v41 = vmul.f32 %v2699_v52, %v3065_v38  ;;  %v3431_v38 = vld [vmem:[#allocation16_spill] sm:$0xff]  ;;  %v3432_v49 = vld [vmem:[#allocation19_spill] sm:$0xff] }
 0x1e8   : > { %v1569_v59 = vadd.f32 %v1478_v10, %v2976_v6  ;;  %v1894_v11 = vpop.f32.mrb[14].mxu1  ;;  %v849_v6 = vld [vmem:[#allocation2 + $0x1cf] sm:$0xff]  ;;  %v787_v13 = vmul.f32 0.0, %v3430_v29  ;;  %v1023_v12 = vmul.f32 %v2706_v16, %v851_v53  ;;  %v1127_v47 = vmul.f32 %v2732_v17, %v3111_v7 }
 0x1e9   : > { %v1603_v40 = vmax.f32 %v1571_v28, 0.0  ;;  %v1572_v23 = vadd.f32 %v1894_v11, %v2998_v35  ;;  %v1481_v34 = vpop.f32.mrb[15].mxu1  ;;  %v984_v24 = vadd.f32 %v952_v32, %v916_v31  ;;  %v955_v44 = vmul.f32 %v2699_v52, %v849_v6  ;;  %v3433_v18 = vld [vmem:[#allocation20_spill] sm:$0xff] }
 0x1ea   : > { %v1601_v25 = vmax.f32 %v1569_v59, 0.0  ;;  %v1570_v60 = vadd.f32 %v1481_v34, %v3010_v61  ;;  %v3221_v1 = vmul.f32 %v2736_v15, %v3200_v30  ;;  %v917_v4 = vadd.f32 %v885_v46, %v3431_v38  ;;  %v853_v29 = vld [vmem:[#allocation2 + $0x20f] sm:$0xff] }
 0x1eb   : > { %1635 = vst.msk [vmem:[%s3041_s9 + $0x70] sm:$0xff] %vm567_vm1, %v1603_v40  ;;  %v1604_v35 = vmax.f32 %v1572_v23, 0.0  ;;  %v890_v2 = vmul.f32 %v2696_v57, %v3130_v0  ;;  %v3228_v20 = vadd.f32 %v1257_v5, %v1221_v42  ;;  %v3230_v9 = vadd.f32 %v1194_v22, %v1158_v36  ;;  %v852_v42 = vld [vmem:[#allocation2 + $0x207] sm:$0xff]  ;;  %v855_v38 = vld [vmem:[#allocation2 + $0x22f] sm:$0xff] }
 0x1ec   : > { %1633 = vst.msk [vmem:[%s3041_s9 + $0x60] sm:$0xff] %vm567_vm1, %v1601_v25  ;;  %v1602_v61 = vmax.f32 %v1570_v60, 0.0  ;;  %v987_v32 = vadd.f32 %v955_v44, %v919_v33  ;;  %v3234_v28 = vmul.f32 %v2749_v43, %v3204_v3  ;;  %v985_v11 = vadd.f32 %v953_v41, %v917_v4  ;;  %v3434_v44 = vld [vmem:[#allocation24_spill] sm:$0xff] }
 0x1ed   : > { %1636 = vst.msk [vmem:[%s3041_s9 + $0x78] sm:$0xff] %vm567_vm1, %v1604_v35  ;;  %v818_v31 = vadd.f32 %v787_v13, %v3432_v49  ;;  %v891_v26 = vmul.f32 %v2696_v57, %v851_v53  ;;  %v1052_v5 = vadd.f32 %v1020_v37, %v984_v24  ;;  %v1021_v34 = vmul.f32 %v2706_v16, %v849_v6 }
 0x1ee   : > { %1634 = vst.msk [vmem:[%s3041_s9 + $0x68] sm:$0xff] %vm567_vm1, %v1602_v61  ;;  %v1897_v21 = vpop.f32.mrb[16].mxu1  ;;  %v1055_v22 = vadd.f32 %v1023_v12, %v987_v32  ;;  %v819_v33 = vadd.f32 %v787_v13, %v3433_v18  ;;  %v888_v37 = vmul.f32 %v2696_v57, %v3128_v48  ;;  %v956_v41 = vmul.f32 %v2699_v52, %v3130_v0 }
 0x1ef   : > { %v1575_v10 = vadd.f32 %v1897_v21, %v3051_v58  ;;  %v1494_v59 = vpop.f32.mrb[17].mxu1  ;;  %v922_v36 = vadd.f32 %v890_v2, %v818_v31  ;;  %v1053_v61 = vadd.f32 %v1021_v34, %v985_v11  ;;  %v958_v24 = vmul.f32 %v2699_v52, %v852_v42 }
 0x1f0   : > { %v1573_v40 = vadd.f32 %v1494_v59, %v3098_v55  ;;  %v1898_v23 = vpop.f32.mrb[18].mxu1  ;;  %v854_v55 = vld [vmem:[#allocation2 + $0x227] sm:$0xff]  ;;  %v923_v13 = vadd.f32 %v891_v26, %v819_v33  ;;  %v920_v12 = vadd.f32 %v888_v37, %v3434_v44  ;;  %v889_v48 = vmul.f32 %v2696_v57, %v849_v6 }
 0x1f1   : > { %v1607_v25 = vmax.f32 %v1575_v10, 0.0  ;;  %v1576_v60 = vadd.f32 %v1898_v23, %v3107_v39  ;;  %v1497_v58 = vpop.f32.mrb[19].mxu1  ;;  %v957_v4 = vmul.f32 %v2699_v52, %v851_v53  ;;  %v1156_v0 = vadd.f32 %v3181_v8, %v1052_v5  ;;  %v3435_v53 = vld [vmem:[#allocation18_spill] sm:$0xff]  ;;  %v1092_v33 = vld [vmem:[#allocation2 + $0x209] sm:$0xff] }
 0x1f2   : > { %v1605_v35 = vmax.f32 %v1573_v40, 0.0  ;;  %v1574_v46 = vadd.f32 %v1497_v58, %v3115_v51  ;;  %v990_v2 = vadd.f32 %v958_v24, %v922_v36  ;;  %v1026_v21 = vmul.f32 %v2706_v16, %v854_v55  ;;  %v1094_v55 = vld [vmem:[#allocation2 + $0x229] sm:$0xff] }
 0x1f3   : > { %1639 = vst.msk [vmem:[%s3041_s9 + $0x90] sm:$0xff] %vm567_vm1, %v1607_v25  ;;  %v1608_v39 = vmax.f32 %v1576_v60, 0.0  ;;  %v959_v32 = vmul.f32 %v2699_v52, %v853_v29  ;;  %v1125_v59 = vmul.f32 %v2732_v17, %v3102_v27  ;;  %v1193_v57 = vmul.f32 %v2736_v15, %v3111_v7 }
 0x1f4   : > { %1637 = vst.msk [vmem:[%s3041_s9 + $0x80] sm:$0xff] %vm567_vm1, %v1605_v35  ;;  %v1606_v51 = vmax.f32 %v1574_v46, 0.0  ;;  %v988_v6 = vadd.f32 %v956_v41, %v920_v12  ;;  %v921_v11 = vadd.f32 %v889_v48, %v3435_v53  ;;  %v1159_v31 = vadd.f32 %v1127_v47, %v1055_v22 }
 0x1f5   : > { %1640 = vst.msk [vmem:[%s3041_s9 + $0x98] sm:$0xff] %vm567_vm1, %v1608_v39  ;;  %v991_v26 = vadd.f32 %v959_v32, %v923_v13  ;;  %v1027_v52 = vmul.f32 %v2706_v16, %v855_v38  ;;  %v1157_v5 = vadd.f32 %v1125_v59, %v1053_v61  ;;  %v1024_v27 = vmul.f32 %v2706_v16, %v852_v42  ;;  %v1093_v13 = vld [vmem:[#allocation2 + $0x211] sm:$0xff] }
 0x1f6   : > { %1638 = vst.msk [vmem:[%s3041_s9 + $0x88] sm:$0xff] %vm567_vm1, %v1606_v51  ;;  %v1901_v10 = vpop.f32.mrb[20].mxu1  ;;  %v989_v34 = vadd.f32 %v957_v4, %v921_v11  ;;  %v1058_v58 = vadd.f32 %v1026_v21, %v990_v2  ;;  %v1227_v42 = vadd.f32 %v3221_v1, %v1159_v31  ;;  %v1294_v37 = vadd.f32 %v3170_v50, %v3230_v9  ;;  %v1095_v2 = vld [vmem:[#allocation2 + $0x231] sm:$0xff] }
 0x1f7   : > { %v1579_v49 = vadd.f32 %v1901_v10, %v3146_v62  ;;  %v1510_v8 = vpop.f32.mrb[21].mxu1  ;;  %v1224_v62 = vadd.f32 %v3185_v19, %v1156_v0  ;;  %v1056_v36 = vadd.f32 %v1024_v27, %v988_v6  ;;  %v1059_v35 = vadd.f32 %v1027_v52, %v991_v26 }
 0x1f8   : > { %v1577_v40 = vadd.f32 %v1510_v8, %v3160_v45  ;;  %v1902_v23 = vpop.f32.mrb[22].mxu1  ;;  %v1025_v45 = vmul.f32 %v2706_v16, %v853_v29  ;;  %v1225_v46 = vadd.f32 %v1193_v57, %v1157_v5  ;;  %v1261_v1 = vmul.f32 %v2749_v43, %v3200_v30 }
 0x1f9   : > { %v1611_v7 = vmax.f32 %v1579_v49, 0.0  ;;  %v1580_v25 = vadd.f32 %v1902_v23, %v3188_v56  ;;  %v1513_v60 = vpop.f32.mrb[23].mxu1  ;;  %v1130_v56 = vmul.f32 %v2732_v17, %v3152_v54  ;;  %v1131_v29 = vmul.f32 %v2732_v17, %v3204_v3 }
 0x1fa   : > { %v1609_v47 = vmax.f32 %v1577_v40, 0.0  ;;  %v1578_v22 = vadd.f32 %v1513_v60, %v3228_v20  ;;  %v1128_v20 = vmul.f32 %v2732_v17, %v3142_v63  ;;  %v1057_v16 = vadd.f32 %v1025_v45, %v989_v34 }
 0x1fb   : > { %1643 = vst.msk [vmem:[%s3041_s9 + $0xb0] sm:$0xff] %vm567_vm1, %v1611_v7  ;;  %v1612_v18 = vmax.f32 %v1580_v25, 0.0  ;;  %v1162_v41 = vadd.f32 %v1130_v56, %v1058_v58  ;;  %v1292_v61 = vadd.f32 %v3196_v14, %v1224_v62  ;;  %v1198_v63 = vmul.f32 %v2736_v15, %v1092_v33 }
 0x1fc   : > { %1641 = vst.msk [vmem:[%s3041_s9 + $0xa0] sm:$0xff] %vm567_vm1, %v1609_v47  ;;  %v1610_v19 = vmax.f32 %v1578_v22, 0.0  ;;  %v1160_v24 = vadd.f32 %v1128_v20, %v1056_v36  ;;  %v1129_v51 = vmul.f32 %v2732_v17, %v3200_v30  ;;  %v1295_v44 = vadd.f32 %v3234_v28, %v1227_v42 }
 0x1fd   : > { %1644 = vst.msk [vmem:[%s3041_s9 + $0xb8] sm:$0xff] %vm567_vm1, %v1612_v18  ;;  %v1266_v12 = vmul.f32 %v2749_v43, %v1094_v55  ;;  %v1163_v38 = vadd.f32 %v1131_v29, %v1059_v35  ;;  %v1293_v0 = vadd.f32 %v1261_v1, %v1225_v46  ;;  %v1196_v14 = vmul.f32 %v2736_v15, %v3152_v54 }
 0x1fe   : > { %1642 = vst.msk [vmem:[%s3041_s9 + $0xa8] sm:$0xff] %vm567_vm1, %v1610_v19  ;;  %v1905_v39 = vpop.f32.mrb[24].mxu1  ;;  %v1161_v21 = vadd.f32 %v1129_v51, %v1057_v16  ;;  %v1230_v30 = vadd.f32 %v1198_v63, %v1162_v41  ;;  %v1199_v28 = vmul.f32 %v2736_v15, %v1093_v13  ;;  %v1197_v53 = vmul.f32 %v2736_v15, %v3204_v3 }
 0x1ff   : > { %v1583_v50 = vadd.f32 %v1905_v39, %v1294_v37  ;;  %v1526_v9 = vpop.f32.mrb[25].mxu1  ;;  %v1228_v6 = vadd.f32 %v1196_v14, %v1160_v24  ;;  %v1267_v49 = vmul.f32 %v2749_v43, %v1095_v2  ;;  %v1264_v31 = vmul.f32 %v2749_v43, %v1092_v33 }
 0x200   : > { %v1581_v48 = vadd.f32 %v1526_v9, %v1292_v61  ;;  %v1906_v4 = vpop.f32.mrb[26].mxu1  ;;  %v1231_v11 = vadd.f32 %v1199_v28, %v1163_v38  ;;  %v1229_v26 = vadd.f32 %v1197_v53, %v1161_v21  ;;  %v1298_v52 = vadd.f32 %v1266_v12, %v1230_v30 }
 0x201   : > { %v1615_v32 = vmax.f32 %v1583_v50, 0.0  ;;  %v1584_v10 = vadd.f32 %v1906_v4, %v1295_v44  ;;  %v1529_v17 = vpop.f32.mrb[27].mxu1  ;;  %v1296_v3 = vadd.f32 %v1264_v31, %v1228_v6  ;;  %v1265_v40 = vmul.f32 %v2749_v43, %v1093_v13 }
 0x202   : > { %v1613_v59 = vmax.f32 %v1581_v48, 0.0  ;;  %v1582_v57 = vadd.f32 %v1529_v17, %v1293_v0  ;;  %v1299_v27 = vadd.f32 %v1267_v49, %v1231_v11 }
 0x203   : > { %1647 = vst.msk [vmem:[%s3041_s9 + $0xd0] sm:$0xff] %vm567_vm1, %v1615_v32  ;;  %v1616_v54 = vmax.f32 %v1584_v10, 0.0  ;;  %v1297_v25 = vadd.f32 %v1265_v40, %v1229_v26 }
 0x204   : > { %1645 = vst.msk [vmem:[%s3041_s9 + $0xc0] sm:$0xff] %vm567_vm1, %v1613_v59  ;;  %v1614_v8 = vmax.f32 %v1582_v57, 0.0 }
 0x205   : > { %1648 = vst.msk [vmem:[%s3041_s9 + $0xd8] sm:$0xff] %vm567_vm1, %v1616_v54 }
 0x206   : > { %1646 = vst.msk [vmem:[%s3041_s9 + $0xc8] sm:$0xff] %vm567_vm1, %v1614_v8  ;;  %v1909_v15 = vpop.f32.mrb[28].mxu1 }
 0x207   : > { %v1587_v23 = vadd.f32 %v1909_v15, %v1298_v52  ;;  %v1542_v5 = vpop.f32.mrb[29].mxu1 }
 0x208   : > { %v1585_v34 = vadd.f32 %v1542_v5, %v1296_v3  ;;  %v1910_v7 = vpop.f32.mrb[30].mxu1 }
 0x209   : > { %v1619_v60 = vmax.f32 %v1587_v23, 0.0  ;;  %v1588_v62 = vadd.f32 %v1910_v7, %v1299_v27  ;;  %v1545_v58 = vpop.f32.mrb[31].mxu1 }
 0x20a   : > { %v1617_v47 = vmax.f32 %v1585_v34, 0.0  ;;  %v1586_v22 = vadd.f32 %v1545_v58, %v1297_v25 }
 0x20b   : > { %1651 = vst.msk [vmem:[%s3041_s9 + $0xf0] sm:$0xff] %vm567_vm1, %v1619_v60  ;;  %v1620_v43 = vmax.f32 %v1588_v62, 0.0 }
 0x20c   : > { %1649 = vst.msk [vmem:[%s3041_s9 + $0xe0] sm:$0xff] %vm567_vm1, %v1617_v47  ;;  %v1618_v36 = vmax.f32 %v1586_v22, 0.0 }
 0x20d   : > { %1652 = vst.msk [vmem:[%s3041_s9 + $0xf8] sm:$0xff] %vm567_vm1, %v1620_v43 }
 0x20e   : > { %1650 = vst.msk [vmem:[%s3041_s9 + $0xe8] sm:$0xff] %vm567_vm1, %v1618_v36 }
 0x20f   : > { %1988 = shalt.err (!%p1985_p3)
}
 0x210   : > { %s1989_s28 = scalar_lea.hbm %s3324_s14, 4096  ;;  %s1993_s5 = scalar_lea.hbm %s3381_s4, 8192 }
 0x211   : > { %p1990_p4 = scmp.ne.s32.totalorder %s3324_s14, %s1989_s28  ;;  %p1994_p9 = scmp.lt.u32.totalorder %s3324_s14, %s3381_s4 }
 0x212   : > { %p1995_p10 = scmp.lt.u32.totalorder %s1993_s5, %s1989_s28  ;;  %p1997_p12 = scmp.lt.u32.totalorder %s1989_s28, %s3324_s14 }
 0x213   : > { %p1991_p7 = pnand %p1990_p4, %p2106_p5 }
 0x214   : > { %p1996_p11 = por %p1995_p10, %p1994_p9 }
 0x215   : > { %p1992_p8 = pneg %p1991_p7 }
 0x216   : > { %p1998_p13 = por %p1997_p12, %p1996_p11 }
 0x218   : > { %p1999_p0 = pnand %p1998_p13, %p1992_p8 }
 0x21a   : > { %2002 = shalt.err (!%p1999_p0)
}
 0x21b   : > { %s2041_s8 = smov 128   ;;  %s2042_s9 = smov 8  }
 0x21c   : > { %1911 = dma.vmem_to_hbm [thread:$0]  (%p2106_p5), %s3326_s11, 4096, %s3324_s14, %s3336_s19, %s2041_s8, %s2041_s8, %s2042_s9  }
 0x21d PF: > { %p1917_p1 = scmp.ge.s32.totalorder %s2037_s18, 2  ;;  %s1682_s10 = sand.u32 1, %s2025_s15  }
 0x21e   : > { %s1683_s12 = scalar_lea.sflag [#allocation4], %s1682_s10 }
 0x21f   : > { %p1914_p2 = pnand %p1917_p1, %p2110_p6 }
 0x221   : > { %2020 = dma.done.wait (!%p1914_p2), %s1683_s12, 4096  }
 0x222   : > { %2022 = vsyncadd (!%p1914_p2), %s1683_s12, 4294963200  ;;  %p14_p3 = scmp.ge.s32.totalorder %s2093_s21, 4   ;;  %s3436_s15 = smov %s2029_s16 }
 0x223   : > { %s3437_s16 = smov %s2033_s17  ;;  %s3438_s17 = smov %s2104_s24 }
 0x224   : > { %s3439_s18 = smov %s2093_s21  ;;  %16 = sbr.rel (!%p14_p3) target bundleno = 3 (0x3), region = 73 }
 0x22b   :  { %1688 = vsyncpa [#allocation4], 1 }
 0x22c   :  { %1690 = vsyncpa [#allocation4 + $0x1], 1 }

</bundles_post_ra>
